<compile_context>
chip_gen: v6e
topology: v6e:2x2x1
jax: 0.10.0
libtpu: 0.0.40
codegen_flags: <defaults>
</compile_context>

<pallas_src>
import functools

import jax
import jax.numpy as jnp
from jax import lax
from jax.experimental import pallas as pl
from jax.experimental.pallas import tpu as pltpu


def conv_dw_kernel(x_ref, wdw_ref, bdw_ref, wpw_ref, scale_ref, shift_ref,
                   o_ref, *, mxu_dtype):
    # x_ref:     (H, W, C)        full image for this batch element (revisited)
    # wdw_ref:   (3, 3, C)        depthwise 3x3 weights
    # bdw_ref:   (1, C)           depthwise bias
    # wpw_ref:   (C, OUP)         pointwise weights (already cast to mxu_dtype)
    # scale_ref: (1, OUP)         folded BN scale = gamma / sqrt(var + eps)
    # shift_ref: (1, OUP)         folded BN shift = beta - mean * scale
    # o_ref:     (TH*W, OUP)      flat output rows for this row-tile
    H, W, C = x_ref.shape
    M, OUP = o_ref.shape
    TH = M // W                                     # rows produced per step

    t = pl.program_id(1)
    nt = pl.num_programs(1)
    start = pl.multiple_of(t * TH, TH)              # first output row

    # ---- gather TH+2 input rows (zero halo at image top/bottom) -------------
    mid = x_ref[pl.ds(start, TH), :, :].astype(jnp.float32)              # (TH, W, C)
    top = x_ref[pl.ds(jnp.maximum(start - 1, 0), 1), :, :]               # (1, W, C)
    bot = x_ref[pl.ds(jnp.minimum(start + TH, H - 1), 1), :, :]          # (1, W, C)
    top = jnp.where(t == 0, 0.0, top.astype(jnp.float32))
    bot = jnp.where(t == nt - 1, 0.0, bot.astype(jnp.float32))
    xs = jnp.concatenate([top, mid, bot], axis=0)                        # (TH+2, W, C)

    # ---- 3 W-shifted tensors, reused across the 3 kh taps -------------------
    zcol = jnp.zeros((TH + 2, 1, C), jnp.float32)
    x_l = jnp.concatenate([zcol, xs[:, : W - 1, :]], axis=1)   # value from w-1
    x_r = jnp.concatenate([xs[:, 1:, :], zcol], axis=1)        # value from w+1

    # ---- depthwise 3x3 (VPU, f32) -------------------------------------------
    wdw = wdw_ref[...].astype(jnp.float32)                     # (3, 3, C)
    acc = jnp.zeros((TH, W, C), jnp.float32)
    for kw, xk in enumerate((x_l, xs, x_r)):                   # unrolled 9 taps
        for kh in range(3):
            tap = wdw[kh, kw, :].reshape(1, 1, C)
            acc = acc + xk[kh:kh + TH, :, :] * tap
    dw = jnp.maximum(acc + bdw_ref[...].reshape(1, 1, C), 0.0)  # +bias, ReLU

    # ---- pointwise 1x1 == matmul over channels (MXU, bf16 in / f32 acc) -----
    flat = dw.reshape(TH * W, C).astype(mxu_dtype)              # lane dim kept = C
    pw = jnp.dot(flat, wpw_ref[...], preferred_element_type=jnp.float32)

    # ---- folded BatchNorm (inference) + ReLU --------------------------------
    y = jnp.maximum(pw * scale_ref[...] + shift_ref[...], 0.0)
    o_ref[...] = y.astype(o_ref.dtype)


def _pick_tile_rows(h, w, target_pixels=128):
    """Row-tile height: multiple of 8 dividing H (else whole image)."""
    cands = [r for r in range(8, h + 1, 8) if h % r == 0]
    if not cands:
        return h
    fitting = [r for r in cands if r * w <= target_pixels]
    return max(fitting) if fitting else min(cands)


def conv_dw_forward(x_nhwc, wdw, bdw, wpw, gamma, beta, run_mean, run_var,
                    eps=1e-5, *, mxu_dtype=jnp.bfloat16, tile_rows=None):
    """Fused depthwise3x3(+bias,ReLU) -> 1x1 conv -> BN -> ReLU.

    x_nhwc: (N, H, W, C)   NHWC activations (keep the model NHWC end-to-end).
    wdw:    (C, 1, 3, 3)   PyTorch depthwise weights.   bdw: (C,)
    wpw:    (OUP, C, 1, 1) PyTorch 1x1 weights (no bias; BN follows).
    Returns (N, H, W, OUP) in the input dtype.
    """
    N, H, W, C = x_nhwc.shape
    OUP = wpw.shape[0]
    assert wdw.shape == (C, 1, 3, 3) and wpw.shape[:2] == (OUP, C)

    TH = tile_rows if tile_rows is not None else _pick_tile_rows(H, W)
    assert H % TH == 0 and (TH % 8 == 0 or TH == H)
    T = H // TH

    # tiny, one-off weight re-packing (no activation traffic)
    wdw_k = jnp.transpose(wdw[:, 0, :, :], (1, 2, 0))                    # (3,3,C)
    bdw_k = bdw.reshape(1, C).astype(jnp.float32)
    wpw_k = jnp.transpose(wpw[:, :, 0, 0], (1, 0)).astype(mxu_dtype)     # (C,OUP)
    inv = gamma / jnp.sqrt(run_var + eps)
    scale = inv.reshape(1, OUP).astype(jnp.float32)
    shift = (beta - run_mean * inv).reshape(1, OUP).astype(jnp.float32)

    kernel = functools.partial(conv_dw_kernel, mxu_dtype=mxu_dtype)

    out_flat = pl.pallas_call(
        kernel,
        out_shape=jax.ShapeDtypeStruct((N, H * W, OUP), x_nhwc.dtype),
        grid=(N, T),
        in_specs=[
            # full (unpadded) image per batch element; constant in t -> one DMA per n
            pl.BlockSpec((None, H, W, C), lambda n, t: (n, 0, 0, 0)),
            pl.BlockSpec((3, 3, C), lambda n, t: (0, 0, 0)),
            pl.BlockSpec((1, C), lambda n, t: (0, 0)),
            pl.BlockSpec((C, OUP), lambda n, t: (0, 0)),
            pl.BlockSpec((1, OUP), lambda n, t: (0, 0)),
            pl.BlockSpec((1, OUP), lambda n, t: (0, 0)),
        ],
        out_specs=pl.BlockSpec((None, TH * W, OUP), lambda n, t: (n, t, 0)),
        compiler_params=pltpu.CompilerParams(
            dimension_semantics=("parallel", "parallel"),
            vmem_limit_bytes=32 * 1024 * 1024,
        ),
    )(x_nhwc, wdw_k, bdw_k, wpw_k, scale, shift)

    return out_flat.reshape(N, H, W, OUP)       # free reshape on the HBM array


def conv_dw_reference(x, wdw, bdw, wpw, gamma, beta, run_mean, run_var, eps=1e-5):
    """Plain-JAX NHWC reference (matches the PyTorch deploy path)."""
    C = x.shape[-1]
    dw_w = jnp.transpose(wdw, (2, 3, 1, 0))          # (3,3,1,C)  HWIO, grouped
    pw_w = jnp.transpose(wpw, (2, 3, 1, 0))          # (1,1,C,OUP)
    dw = lax.conv_general_dilated(
        x, dw_w, (1, 1), ((1, 1), (1, 1)),
        dimension_numbers=("NHWC", "HWIO", "NHWC"),
        feature_group_count=C, precision=lax.Precision.HIGHEST)
    dw = jnp.maximum(dw + bdw, 0.0)
    pw = lax.conv_general_dilated(
        dw, pw_w, (1, 1), ((0, 0), (0, 0)),
        dimension_numbers=("NHWC", "HWIO", "NHWC"),
        precision=lax.Precision.HIGHEST)
    inv = gamma / jnp.sqrt(run_var + eps)
    return jnp.maximum(pw * inv + (beta - run_mean * inv), 0.0)


if __name__ == "__main__":
    key = jax.random.PRNGKey(0)

    def make_inputs(k, n, c, oup, h, w):
        ks = jax.random.split(k, 8)
        x = jax.random.normal(ks[0], (n, h, w, c), jnp.float32)
        wdw = jax.random.normal(ks[1], (c, 1, 3, 3), jnp.float32) * 0.2
        bdw = jax.random.normal(ks[2], (c,), jnp.float32) * 0.1
        wpw = jax.random.normal(ks[3], (oup, c, 1, 1), jnp.float32) * 0.2
        gamma = 1.0 + 0.1 * jax.random.normal(ks[4], (oup,), jnp.float32)
        beta = 0.1 * jax.random.normal(ks[5], (oup,), jnp.float32)
        mean = 0.1 * jax.random.normal(ks[6], (oup,), jnp.float32)
        var = jnp.abs(1.0 + 0.1 * jax.random.normal(ks[7], (oup,), jnp.float32))
        return x, wdw, bdw, wpw, gamma, beta, mean, var

    k1, k2 = jax.random.split(key)

    # Config A: realistic MobileNet block (64 -> 128), bf16 MXU operands,
    # grid = (batch=2, row-tiles=2), lane-dense output stores (OUP=128).
    args = make_inputs(k1, 2, 64, 128, 16, 16)
    out = conv_dw_forward(*args, mxu_dtype=jnp.bfloat16)
    out = jax.block_until_ready(out)
    ref = conv_dw_reference(*args)
    assert out.shape == ref.shape == (2, 16, 16, 128), out.shape
    assert jnp.allclose(out, ref, atol=3e-2, rtol=3e-2), (
        "bf16 path mismatch, max abs err = %g"
        % float(jnp.max(jnp.abs(out - ref))))

    # Config B: small odd sizes (single row tile, OUP not a lane multiple),
    # f32 MXU operands.
    args = make_inputs(k2, 1, 32, 48, 8, 8)
    out = conv_dw_forward(*args, mxu_dtype=jnp.float32)
    out = jax.block_until_ready(out)
    ref = conv_dw_reference(*args)
    assert out.shape == ref.shape == (1, 8, 8, 48), out.shape
    assert jnp.allclose(out, ref, atol=2e-2, rtol=2e-2), (
        "f32 path mismatch, max abs err = %g"
        % float(jnp.max(jnp.abs(out - ref))))

    print("KERNEL_OK")
</pallas_src>

<mosaic_0001>
module attributes {stable_mosaic.version = 11 : i64} {
  func.func @conv_dw_kernel(%arg0: i32, %arg1: i32, %arg2: memref<1x16x16x64xf32, #tpu.memory_space<vmem>>, %arg3: memref<3x3x64xf32, #tpu.memory_space<vmem>>, %arg4: memref<1x64xf32, #tpu.memory_space<vmem>>, %arg5: memref<64x128xbf16, #tpu.memory_space<vmem>>, %arg6: memref<1x128xf32, #tpu.memory_space<vmem>>, %arg7: memref<1x128xf32, #tpu.memory_space<vmem>>, %arg8: memref<1x128x128xf32, #tpu.memory_space<vmem>>) attributes {dimension_semantics = [#tpu.dimension_semantics<parallel>, #tpu.dimension_semantics<parallel>], iteration_bounds = array<i64: 2, 2>, scalar_prefetch = 0 : i64, scratch_operands = 0 : i64, tpu.core_type = #tpu.core_type<tc>, window_params = [{transform_indices = @transform_0, window_bounds = array<i64: 1, 16, 16, 64>}, {pipeline_mode = #tpu.pipeline_mode<synchronous>, transform_indices = @transform_1, window_bounds = array<i64: 3, 3, 64>}, {pipeline_mode = #tpu.pipeline_mode<synchronous>, transform_indices = @transform_2, window_bounds = array<i64: 1, 64>}, {pipeline_mode = #tpu.pipeline_mode<synchronous>, transform_indices = @transform_3, window_bounds = array<i64: 64, 128>}, {pipeline_mode = #tpu.pipeline_mode<synchronous>, transform_indices = @transform_4, window_bounds = array<i64: 1, 128>}, {pipeline_mode = #tpu.pipeline_mode<synchronous>, transform_indices = @transform_5, window_bounds = array<i64: 1, 128>}, {transform_indices = @transform_6, window_bounds = array<i64: 1, 128, 128>}]} {
    %c8_i32 = arith.constant 8 : i32
    %0 = arith.muli %arg1, %c8_i32 : i32
    %1 = tpu.assume_multiple %0, 8 : i32
    %c0 = arith.constant 0 : index
    %2 = arith.index_cast %1 : i32 to index
    %c0_0 = arith.constant 0 : index
    %c0_1 = arith.constant 0 : index
    %3 = vector.load %arg2[%c0, %2, %c0_0, %c0_1] : memref<1x16x16x64xf32, #tpu.memory_space<vmem>>, vector<1x8x16x64xf32>
    %4 = vector.shape_cast %3 : vector<1x8x16x64xf32> to vector<8x16x64xf32>
    %c1_i32 = arith.constant 1 : i32
    %5 = arith.subi %1, %c1_i32 : i32
    %c0_i32 = arith.constant 0 : i32
    %6 = arith.maxsi %5, %c0_i32 : i32
    %c0_2 = arith.constant 0 : index
    %7 = arith.index_cast %6 : i32 to index
    %c0_3 = arith.constant 0 : index
    %c0_4 = arith.constant 0 : index
    %8 = vector.load %arg2[%c0_2, %7, %c0_3, %c0_4] : memref<1x16x16x64xf32, #tpu.memory_space<vmem>>, vector<1x1x16x64xf32>
    %9 = vector.shape_cast %8 : vector<1x1x16x64xf32> to vector<1x16x64xf32>
    %c8_i32_5 = arith.constant 8 : i32
    %10 = arith.addi %1, %c8_i32_5 : i32
    %c15_i32 = arith.constant 15 : i32
    %11 = arith.minsi %10, %c15_i32 : i32
    %c0_6 = arith.constant 0 : index
    %12 = arith.index_cast %11 : i32 to index
    %c0_7 = arith.constant 0 : index
    %c0_8 = arith.constant 0 : index
    %13 = vector.load %arg2[%c0_6, %12, %c0_7, %c0_8] : memref<1x16x16x64xf32, #tpu.memory_space<vmem>>, vector<1x1x16x64xf32>
    %14 = vector.shape_cast %13 : vector<1x1x16x64xf32> to vector<1x16x64xf32>
    %c0_i32_9 = arith.constant 0 : i32
    %15 = arith.cmpi eq, %arg1, %c0_i32_9 : i32
    %cst = arith.constant 0.000000e+00 : f32
    %16 = vector.broadcast %cst : f32 to vector<1x16x64xf32>
    %17 = arith.select %15, %16, %9 : vector<1x16x64xf32>
    %c1_i32_10 = arith.constant 1 : i32
    %18 = arith.cmpi eq, %arg1, %c1_i32_10 : i32
    %cst_11 = arith.constant 0.000000e+00 : f32
    %19 = vector.broadcast %cst_11 : f32 to vector<1x16x64xf32>
    %20 = arith.select %18, %19, %14 : vector<1x16x64xf32>
    %21 = tpu.concatenate %17, %4, %20 in 0 : vector<1x16x64xf32>, vector<8x16x64xf32>, vector<1x16x64xf32> -> vector<10x16x64xf32>
    %cst_12 = arith.constant 0.000000e+00 : f32
    %22 = vector.broadcast %cst_12 : f32 to vector<10x1x64xf32>
    %23 = vector.extract_strided_slice %21 {offsets = [0, 0, 0], sizes = [10, 15, 64], strides = [1, 1, 1]} : vector<10x16x64xf32> to vector<10x15x64xf32>
    %24 = tpu.concatenate %22, %23 in 1 : vector<10x1x64xf32>, vector<10x15x64xf32> -> vector<10x16x64xf32>
    %25 = vector.extract_strided_slice %21 {offsets = [0, 1, 0], sizes = [10, 15, 64], strides = [1, 1, 1]} : vector<10x16x64xf32> to vector<10x15x64xf32>
    %26 = tpu.concatenate %25, %22 in 1 : vector<10x15x64xf32>, vector<10x1x64xf32> -> vector<10x16x64xf32>
    %c0_13 = arith.constant 0 : index
    %c0_14 = arith.constant 0 : index
    %c0_15 = arith.constant 0 : index
    %27 = vector.load %arg3[%c0_13, %c0_14, %c0_15] : memref<3x3x64xf32, #tpu.memory_space<vmem>>, vector<3x3x64xf32>
    %cst_16 = arith.constant 0.000000e+00 : f32
    %28 = vector.broadcast %cst_16 : f32 to vector<8x16x64xf32>
    %29 = vector.extract_strided_slice %27 {offsets = [0, 0, 0], sizes = [1, 1, 64], strides = [1, 1, 1]} : vector<3x3x64xf32> to vector<1x1x64xf32>
    %30 = vector.shape_cast %29 : vector<1x1x64xf32> to vector<64xf32>
    %31 = vector.shape_cast %30 : vector<64xf32> to vector<1x1x64xf32>
    %32 = vector.extract_strided_slice %24 {offsets = [0, 0, 0], sizes = [8, 16, 64], strides = [1, 1, 1]} : vector<10x16x64xf32> to vector<8x16x64xf32>
    %33 = vector.broadcast %31 : vector<1x1x64xf32> to vector<8x16x64xf32>
    %34 = arith.mulf %32, %33 : vector<8x16x64xf32>
    %35 = arith.addf %28, %34 : vector<8x16x64xf32>
    %36 = vector.extract_strided_slice %27 {offsets = [1, 0, 0], sizes = [1, 1, 64], strides = [1, 1, 1]} : vector<3x3x64xf32> to vector<1x1x64xf32>
    %37 = vector.shape_cast %36 : vector<1x1x64xf32> to vector<64xf32>
    %38 = vector.shape_cast %37 : vector<64xf32> to vector<1x1x64xf32>
    %39 = vector.extract_strided_slice %24 {offsets = [1, 0, 0], sizes = [8, 16, 64], strides = [1, 1, 1]} : vector<10x16x64xf32> to vector<8x16x64xf32>
    %40 = vector.broadcast %38 : vector<1x1x64xf32> to vector<8x16x64xf32>
    %41 = arith.mulf %39, %40 : vector<8x16x64xf32>
    %42 = arith.addf %35, %41 : vector<8x16x64xf32>
    %43 = vector.extract_strided_slice %27 {offsets = [2, 0, 0], sizes = [1, 1, 64], strides = [1, 1, 1]} : vector<3x3x64xf32> to vector<1x1x64xf32>
    %44 = vector.shape_cast %43 : vector<1x1x64xf32> to vector<64xf32>
    %45 = vector.shape_cast %44 : vector<64xf32> to vector<1x1x64xf32>
    %46 = vector.extract_strided_slice %24 {offsets = [2, 0, 0], sizes = [8, 16, 64], strides = [1, 1, 1]} : vector<10x16x64xf32> to vector<8x16x64xf32>
    %47 = vector.broadcast %45 : vector<1x1x64xf32> to vector<8x16x64xf32>
    %48 = arith.mulf %46, %47 : vector<8x16x64xf32>
    %49 = arith.addf %42, %48 : vector<8x16x64xf32>
    %50 = vector.extract_strided_slice %27 {offsets = [0, 1, 0], sizes = [1, 1, 64], strides = [1, 1, 1]} : vector<3x3x64xf32> to vector<1x1x64xf32>
    %51 = vector.shape_cast %50 : vector<1x1x64xf32> to vector<64xf32>
    %52 = vector.shape_cast %51 : vector<64xf32> to vector<1x1x64xf32>
    %53 = vector.extract_strided_slice %21 {offsets = [0, 0, 0], sizes = [8, 16, 64], strides = [1, 1, 1]} : vector<10x16x64xf32> to vector<8x16x64xf32>
    %54 = vector.broadcast %52 : vector<1x1x64xf32> to vector<8x16x64xf32>
    %55 = arith.mulf %53, %54 : vector<8x16x64xf32>
    %56 = arith.addf %49, %55 : vector<8x16x64xf32>
    %57 = vector.extract_strided_slice %27 {offsets = [1, 1, 0], sizes = [1, 1, 64], strides = [1, 1, 1]} : vector<3x3x64xf32> to vector<1x1x64xf32>
    %58 = vector.shape_cast %57 : vector<1x1x64xf32> to vector<64xf32>
    %59 = vector.shape_cast %58 : vector<64xf32> to vector<1x1x64xf32>
    %60 = vector.extract_strided_slice %21 {offsets = [1, 0, 0], sizes = [8, 16, 64], strides = [1, 1, 1]} : vector<10x16x64xf32> to vector<8x16x64xf32>
    %61 = vector.broadcast %59 : vector<1x1x64xf32> to vector<8x16x64xf32>
    %62 = arith.mulf %60, %61 : vector<8x16x64xf32>
    %63 = arith.addf %56, %62 : vector<8x16x64xf32>
    %64 = vector.extract_strided_slice %27 {offsets = [2, 1, 0], sizes = [1, 1, 64], strides = [1, 1, 1]} : vector<3x3x64xf32> to vector<1x1x64xf32>
    %65 = vector.shape_cast %64 : vector<1x1x64xf32> to vector<64xf32>
    %66 = vector.shape_cast %65 : vector<64xf32> to vector<1x1x64xf32>
    %67 = vector.extract_strided_slice %21 {offsets = [2, 0, 0], sizes = [8, 16, 64], strides = [1, 1, 1]} : vector<10x16x64xf32> to vector<8x16x64xf32>
    %68 = vector.broadcast %66 : vector<1x1x64xf32> to vector<8x16x64xf32>
    %69 = arith.mulf %67, %68 : vector<8x16x64xf32>
    %70 = arith.addf %63, %69 : vector<8x16x64xf32>
    %71 = vector.extract_strided_slice %27 {offsets = [0, 2, 0], sizes = [1, 1, 64], strides = [1, 1, 1]} : vector<3x3x64xf32> to vector<1x1x64xf32>
    %72 = vector.shape_cast %71 : vector<1x1x64xf32> to vector<64xf32>
    %73 = vector.shape_cast %72 : vector<64xf32> to vector<1x1x64xf32>
    %74 = vector.extract_strided_slice %26 {offsets = [0, 0, 0], sizes = [8, 16, 64], strides = [1, 1, 1]} : vector<10x16x64xf32> to vector<8x16x64xf32>
    %75 = vector.broadcast %73 : vector<1x1x64xf32> to vector<8x16x64xf32>
    %76 = arith.mulf %74, %75 : vector<8x16x64xf32>
    %77 = arith.addf %70, %76 : vector<8x16x64xf32>
    %78 = vector.extract_strided_slice %27 {offsets = [1, 2, 0], sizes = [1, 1, 64], strides = [1, 1, 1]} : vector<3x3x64xf32> to vector<1x1x64xf32>
    %79 = vector.shape_cast %78 : vector<1x1x64xf32> to vector<64xf32>
    %80 = vector.shape_cast %79 : vector<64xf32> to vector<1x1x64xf32>
    %81 = vector.extract_strided_slice %26 {offsets = [1, 0, 0], sizes = [8, 16, 64], strides = [1, 1, 1]} : vector<10x16x64xf32> to vector<8x16x64xf32>
    %82 = vector.broadcast %80 : vector<1x1x64xf32> to vector<8x16x64xf32>
    %83 = arith.mulf %81, %82 : vector<8x16x64xf32>
    %84 = arith.addf %77, %83 : vector<8x16x64xf32>
    %85 = vector.extract_strided_slice %27 {offsets = [2, 2, 0], sizes = [1, 1, 64], strides = [1, 1, 1]} : vector<3x3x64xf32> to vector<1x1x64xf32>
    %86 = vector.shape_cast %85 : vector<1x1x64xf32> to vector<64xf32>
    %87 = vector.shape_cast %86 : vector<64xf32> to vector<1x1x64xf32>
    %88 = vector.extract_strided_slice %26 {offsets = [2, 0, 0], sizes = [8, 16, 64], strides = [1, 1, 1]} : vector<10x16x64xf32> to vector<8x16x64xf32>
    %89 = vector.broadcast %87 : vector<1x1x64xf32> to vector<8x16x64xf32>
    %90 = arith.mulf %88, %89 : vector<8x16x64xf32>
    %91 = arith.addf %84, %90 : vector<8x16x64xf32>
    %c0_17 = arith.constant 0 : index
    %c0_18 = arith.constant 0 : index
    %92 = vector.load %arg4[%c0_17, %c0_18] : memref<1x64xf32, #tpu.memory_space<vmem>>, vector<1x64xf32>
    %93 = vector.shape_cast %92 : vector<1x64xf32> to vector<1x1x64xf32>
    %94 = vector.broadcast %93 : vector<1x1x64xf32> to vector<8x16x64xf32>
    %95 = arith.addf %91, %94 : vector<8x16x64xf32>
    %cst_19 = arith.constant 0.000000e+00 : f32
    %96 = vector.broadcast %cst_19 : f32 to vector<8x16x64xf32>
    %97 = arith.maximumf %95, %96 : vector<8x16x64xf32>
    %98 = vector.shape_cast %97 : vector<8x16x64xf32> to vector<128x64xf32>
    %99 = arith.truncf %98 : vector<128x64xf32> to vector<128x64xbf16>
    %c0_20 = arith.constant 0 : index
    %c0_21 = arith.constant 0 : index
    %100 = vector.load %arg5[%c0_20, %c0_21] : memref<64x128xbf16, #tpu.memory_space<vmem>>, vector<64x128xbf16>
    %cst_22 = arith.constant dense<0.000000e+00> : vector<128x128xf32>
    %101 = tpu.matmul %99, %100, %cst_22 {dimension_numbers = #tpu.dot_dimension_numbers<[1], [0], [0], [1], [0, 0, 1, 1], [], []>} : vector<128x64xbf16>, vector<64x128xbf16>, vector<128x128xf32> -> vector<128x128xf32>
    %c0_23 = arith.constant 0 : index
    %c0_24 = arith.constant 0 : index
    %102 = vector.load %arg6[%c0_23, %c0_24] : memref<1x128xf32, #tpu.memory_space<vmem>>, vector<1x128xf32>
    %103 = vector.broadcast %102 : vector<1x128xf32> to vector<128x128xf32>
    %104 = arith.mulf %101, %103 : vector<128x128xf32>
    %c0_25 = arith.constant 0 : index
    %c0_26 = arith.constant 0 : index
    %105 = vector.load %arg7[%c0_25, %c0_26] : memref<1x128xf32, #tpu.memory_space<vmem>>, vector<1x128xf32>
    %106 = vector.broadcast %105 : vector<1x128xf32> to vector<128x128xf32>
    %107 = arith.addf %104, %106 : vector<128x128xf32>
    %cst_27 = arith.constant 0.000000e+00 : f32
    %108 = vector.broadcast %cst_27 : f32 to vector<128x128xf32>
    %109 = arith.maximumf %107, %108 : vector<128x128xf32>
    %c0_28 = arith.constant 0 : index
    %c0_29 = arith.constant 0 : index
    %c0_30 = arith.constant 0 : index
    %110 = vector.load %arg8[%c0_28, %c0_29, %c0_30] : memref<1x128x128xf32, #tpu.memory_space<vmem>>, vector<1x128x128xf32>
    %111 = vector.shape_cast %110 : vector<1x128x128xf32> to vector<128x128xf32>
    %112 = vector.shape_cast %109 : vector<128x128xf32> to vector<1x128x128xf32>
    tpu.vector_store %arg8[%c0_28, %c0_29, %c0_30], %112 {strides = array<i32>} : memref<1x128x128xf32, #tpu.memory_space<vmem>>, vector<1x128x128xf32>,
    return
  }
  func.func @transform_0(%arg0: i32, %arg1: i32) -> (i32, i32, i32, i32) {
    %c0_i32 = arith.constant 0 : i32
    %c0_i32_0 = arith.constant 0 : i32
    %c0_i32_1 = arith.constant 0 : i32
    %c0_i32_2 = arith.constant 0 : i32
    return %arg0, %c0_i32, %c0_i32_0, %c0_i32_1 : i32, i32, i32, i32
  }
  func.func @transform_1(%arg0: i32, %arg1: i32) -> (i32, i32, i32) {
    %c0_i32 = arith.constant 0 : i32
    %c0_i32_0 = arith.constant 0 : i32
    %c0_i32_1 = arith.constant 0 : i32
    %c0_i32_2 = arith.constant 0 : i32
    return %c0_i32, %c0_i32_0, %c0_i32_1 : i32, i32, i32
  }
  func.func @transform_2(%arg0: i32, %arg1: i32) -> (i32, i32) {
    %c0_i32 = arith.constant 0 : i32
    %c0_i32_0 = arith.constant 0 : i32
    %c0_i32_1 = arith.constant 0 : i32
    return %c0_i32, %c0_i32_0 : i32, i32
  }
  func.func @transform_3(%arg0: i32, %arg1: i32) -> (i32, i32) {
    %c0_i32 = arith.constant 0 : i32
    %c0_i32_0 = arith.constant 0 : i32
    %c0_i32_1 = arith.constant 0 : i32
    return %c0_i32, %c0_i32_0 : i32, i32
  }
  func.func @transform_4(%arg0: i32, %arg1: i32) -> (i32, i32) {
    %c0_i32 = arith.constant 0 : i32
    %c0_i32_0 = arith.constant 0 : i32
    %c0_i32_1 = arith.constant 0 : i32
    return %c0_i32, %c0_i32_0 : i32, i32
  }
  func.func @transform_5(%arg0: i32, %arg1: i32) -> (i32, i32) {
    %c0_i32 = arith.constant 0 : i32
    %c0_i32_0 = arith.constant 0 : i32
    %c0_i32_1 = arith.constant 0 : i32
    return %c0_i32, %c0_i32_0 : i32, i32
  }
  func.func @transform_6(%arg0: i32, %arg1: i32) -> (i32, i32, i32) {
    %c0_i32 = arith.constant 0 : i32
    %c0_i32_0 = arith.constant 0 : i32
    return %arg0, %arg1, %c0_i32 : i32, i32, i32
  }
}

</mosaic_0001>

<bundles_post_ra>
// kernel: tpu_custom_call.1
= control target key start
LH: loop header
LB: loop body
LE: loop exit
PB: predicated region body
PF: predicated region fallthrough
CT: control target
= control target key end

     0   :  { %s2615_s0 = inlined_call_operand.hbm [shape: f32[2,16,16,64], index: 0, kind: input, shape index: {}]   ;;  %s2616_s1 = inlined_call_operand.hbm [shape: f32[3,3,64], index: 1, kind: input, shape index: {}]   ;;  %s2617_s2 = inlined_call_operand.vmem [shape: f32[1,64], index: 2, kind: input, shape index: {}]   ;;  %s2618_s3 = inlined_call_operand.hbm [shape: bf16[64,128], index: 3, kind: input, shape index: {}]   ;;  %s2619_s4 = inlined_call_operand.vmem [shape: f32[1,128], index: 4, kind: input, shape index: {}]   ;;  %s2620_s5 = inlined_call_operand.vmem [shape: f32[1,128], index: 5, kind: input, shape index: {}]   ;;  %s2621_s6 = inlined_call_operand.hbm [shape: f32[2,256,128], index: 6, kind: output, shape index: {}]  }
   0x1   :  { %2645 = sst [smem:[#allocation33_spill]] %s2616_s1 }
   0x2   :  { %2646 = sst [smem:[#allocation34_spill]] %s2618_s3 }
   0x3   :  { %2647 = sst [smem:[#allocation35_spill]] %s2620_s5 }
   0x4   :  { %2648 = sst [smem:[#allocation36_spill]] %s2621_s6 }
   0x5   :  { %11 = vsyncpa [#allocation3], 0 }
   0x6   :  { %13 = vsyncpa [#allocation3 + $0x1], 0 }
   0x7   :  { %14 = vsyncpa [#allocation6], 0 }
   0x8   :  { %15 = vsyncpa [#allocation4], 0 }
   0x9   :  { %17 = vsyncpa [#allocation4 + $0x1], 0  ;;  %s1718_s21 = smov 0   ;;  %s1720_s22 = smov 0  }
   0xa   :  { %s1722_s23 = smov 0   ;;  %s1724_s24 = smov 0  }
   0xb   :  { %s1726_s25 = smov 0   ;;  %s1728_s26 = smov 0  }
   0xc   :  { %s1730_s27 = smov 0   ;;  %s1732_s28 = smov 0  }
   0xd   :  { %s1734_s29 = smov 0   ;;  %s1736_s30 = smov 0  }
   0xe   :  { %s1738_s7 = smov 0  }
   0xf LB: > { %2649 = sst [smem:[#allocation12_spill]] %s1631_s21  ;;  %s1236_s8 = sadd.s32 4294967295, %s1671_s7   ;;  %s1671_s7 = sphi %s1738_s7, %s23_s7   ;;  %s1667_s30 = sphi %s1736_s30, %s2716_s30   ;;  %s1663_s29 = sphi %s1734_s29, %s2715_s29   ;;  %s1659_s28 = sphi %s1732_s28, %s2714_s28   ;;  %s1655_s27 = sphi %s1730_s27, %s2706_s27   ;;  %s1651_s26 = sphi %s1728_s26, %s2713_s26   ;;  %s1647_s25 = sphi %s1726_s25, %s2712_s25   ;;  %s1643_s24 = sphi %s1724_s24, %s2711_s24   ;;  %s1639_s23 = sphi %s1722_s23, %s2710_s23   ;;  %s1635_s22 = sphi %s1720_s22, %s2709_s22   ;;  %s1631_s21 = sphi %s1718_s21, %s2708_s21  }
  0x10   : > { %2650 = sst [smem:[#allocation13_spill]] %s1659_s28  ;;  %s1237_s9 = sadd.s32 4294967294, %s1671_s7  }
  0x11   : > { %2651 = sst [smem:[#allocation14_spill]] %s1663_s29  ;;  %p55_p0 = scmp.ne.s32.totalorder %s1647_s25, %s1643_s24 }
  0x12   : > { %p1774_p1 = scmp.eq.s32.totalorder %s1236_s8, 0  ;;  %p185_p2 = scmp.ne.s32.totalorder %s1639_s23, %s1635_s22 }
  0x13   : > { %p186_p4 = scmp.eq.s32.totalorder %s1236_s8, 3  ;;  %p191_p5 = scmp.ne.s32.totalorder %s1635_s22, %s1631_s21 }
  0x14   : > { %s2652_s10 = scalar_select %p1774_p1, 1, 0 }
  0x15   : > { %p1783_p3 = por %p1774_p1, %p55_p0  ;;  %p192_p6 = scmp.eq.s32.totalorder %s1237_s9, 3 }
  0x16   : > { %p1789_p7 = por %p186_p4, %p185_p2  ;;  %p1238_p8 = scmp.ge.s32.totalorder %s1671_s7, 1 }
  0x17   : > { %p1794_p9 = por %p192_p6, %p191_p5  ;;  %p199_p10 = scmp.lt.s32.totalorder %s1671_s7, 5 }
  0x18   : > { %s2654_s13 = scalar_select %p1789_p7, 1, 0 }
  0x19   : > { %s2656_s14 = scalar_select %p1794_p9, 1, 0 }
  0x1a   : > { %2655 = sst [smem:[#allocation15_spill]] %s2654_s13  ;;  %p1799_p11 = pnand %p1238_p8, %p199_p10 }
  0x1b   : > { %2657 = sst [smem:[#allocation16_spill]] %s2656_s14  ;;  %s1673_s16 = smov [#allocation5]  }
  0x1c   : > { %s211_s17 = sshll.u32 %s1673_s16, 4  ;;  %p1334_p12 = pneg %p1799_p11  ;;  %s212_s17 = int_to_ptr.vmem [resolvable:$true] %s211_s17 }
  0x1d   : > { %s1674_s19 = smov [#allocation7]   ;;  %s1478_s24 = scalar_lea.vmem %s212_s17, 192 }
  0x1e   : > { %p1807_p13 = pnand %p1334_p12, %p1774_p1  ;;  %s227_s20 = sshll.u32 %s1674_s19, 4  ;;  %s228_s20 = int_to_ptr.vmem [resolvable:$true] %s227_s20 }
  0x1f   : > { %p1479_p2 = scmp.ne.s32.totalorder %s212_s17, %s1478_s24  ;;  %p1486_p6 = scmp.lt.s32.totalorder %s212_s17, %s212_s17 }
  0x20   : > { %p1469_p0 = pneg %p1807_p13  ;;  %p1487_p8 = scmp.lt.s32.totalorder %s1478_s24, %s1478_s24 }
  0x22   : > { %p1481_p4 = pnand %p1479_p2, %p1469_p0  ;;  %p1488_p10 = por %p1487_p8, %p1486_p6 }
  0x24   : > { %p1482_p5 = pneg %p1481_p4 }
  0x26   : > { %p1489_p12 = pnand %p1488_p10, %p1482_p5 }
  0x28   : > { %1492 = shalt.err (!%p1489_p12)
}
  0x29   : > { %s1675_s8 = smov 64   ;;  %s1676_s9 = smov 4  }
  0x2a   : > { %s2660_s1 = sld [smem:[#allocation33_spill]]  ;;  %s1504_s11 = scalar_lea.vmem %s228_s20, 512 }
  0x2b   : > { %p1505_p9 = scmp.ne.s32.totalorder %s228_s20, %s1504_s11  ;;  %p1512_p7 = scmp.lt.s32.totalorder %s228_s20, %s228_s20 }
  0x2c   : > { %p1513_p1 = scmp.lt.s32.totalorder %s1504_s11, %s1504_s11 }
  0x2d   : > { %p1507_p2 = pnand %p1505_p9, %p1469_p0 }
  0x2e   : > { %p1514_p6 = por %p1513_p1, %p1512_p7 }
  0x2f   : > { %p1508_p4 = pneg %p1507_p2 }
  0x30   : > { %1337 = dma.hbm_to_vmem [thread:$0]  (!%p1807_p13), %s2660_s1, 192, %s212_s17, [#allocation6], %s1675_s8, %s1675_s8, %s1676_s9  }
  0x31   : > { %p1515_p5 = pnand %p1514_p6, %p1508_p4 }
  0x33   : > { %1518 = shalt.err (!%p1515_p5)
}
  0x34   : > { %s2661_s3 = sld [smem:[#allocation34_spill]]  ;;  %s32_s11 = sadd.s32 1, %s1663_s29 }
  0x35   : > { %s35_s17 = sadd.s32 1, %s1667_s30  ;;  %p33_p1 = scmp.ge.s32.totalorder %s32_s11, 2 }
  0x36   : > { %s42_s18 = sadd.s32 1, %s1651_s26  ;;  %p49_p7 = scmp.ne.s32.totalorder %s1651_s26, %s1647_s25 }
  0x37   : > { %p50_p9 = scmp.eq.s32.totalorder %s1671_s7, 0  ;;  %s2718_s11 = smov (%p33_p1, %s32_s11), 0 }
  0x38   : > { %2662 = sst [smem:[#allocation17_spill]] %s2718_s11  ;;  %s2720_s17 = smov (!%p33_p1, %s35_s17), %s1667_s30 }
  0x39   : > { %p1838_p0 = por %p50_p9, %p49_p7  ;;  %s171_s16 = ssub.s32 %s1663_s29, %s2718_s11 }
  0x3a   : > { %1340 = dma.hbm_to_vmem [thread:$0]  (!%p1807_p13), %s2661_s3, 512, %s228_s20, [#allocation6], %s1675_s8, %s1675_s8, %s1676_s9  }
  0x3b   : > { %p37_p13 = scmp.ge.s32.totalorder %s2720_s17, 2  ;;  %p1351_p8 = scmp.lt.s32.totalorder %s1671_s7, 4 }
  0x3c   : > { %s247_s20 = sand.u32 1, %s1651_s26   ;;  %s1276_s8 = sshll.u32 %s1667_s30, 12 }
  0x3d   : > { %s2722_s17 = smov (%p37_p13, %s2720_s17), 0  ;;  %s1242_s9 = sshll.u32 %s247_s20, 8 }
  0x3e   : > { %s39_s19 = ssub.s32 %s1667_s30, %s2722_s17  ;;  %s257_s21 = scalar_lea.hbm %s2615_s0, %s1276_s8 }
  0x3f   : > { %p40_p10 = scmp.eq.s32.totalorder %s39_s19, 0  ;;  %s172_s24 = sor.u32 %s171_s16, %s39_s19 }
  0x40   : > { %p173_p12 = scmp.eq.s32.totalorder %s172_s24, 0  ;;  %s2664_s11 = sadd.s32 1, %s1639_s23 }
  0x41   : > { %s1855_s6 = scalar_select %p40_p10, %s1651_s26, %s42_s18  }
  0x42   : > { %s1860_s29 = scalar_select %p173_p12, %s1639_s23, %s2664_s11  }
  0x43   : > { %s251_s13 = scalar_lea.vmem [#allocation2], %s1242_s9  ;;  %p1866_p2 = pnand %p1351_p8, %p1838_p0 }
  0x44   : > { %s258_s28 = sshll.u32 %s251_s13, 4  ;;  %s248_s16 = scalar_lea.sflag [#allocation3], %s247_s20  ;;  %s259_s28 = int_to_ptr.vmem [resolvable:$true] %s258_s28 }
  0x45   : > { %p1521_p4 = pneg %p1866_p2  ;;  %s1532_s1 = scalar_lea.vmem %s259_s28, 4096 }
  0x46   : > { %p1533_p6 = scmp.ne.s32.totalorder %s259_s28, %s1532_s1  ;;  %s1677_s3 = smov [#allocation2]  }
  0x47   : > { %s1537_s11 = sshll.u32 %s1677_s3, 4  ;;  %s1538_s11 = int_to_ptr.vmem [resolvable:$false] %s1537_s11 }
  0x48   : > { %p1535_p5 = pnand %p1533_p6, %p1521_p4  ;;  %s1539_s18 = scalar_lea.vmem %s1538_s11, 8192 }
  0x49   : > { %p1540_p7 = scmp.lt.s32.totalorder %s259_s28, %s1538_s11  ;;  %p1541_p9 = scmp.lt.s32.totalorder %s1539_s18, %s1532_s1 }
  0x4a   : > { %p1536_p1 = pneg %p1535_p5 }
  0x4b   : > { %p1542_p13 = por %p1541_p9, %p1540_p7 }
  0x4d   : > { %p1543_p0 = pnand %p1542_p13, %p1536_p1 }
  0x4f   : > { %1546 = shalt.err (!%p1543_p0)
}
  0x50   : > { %s1678_s13 = smov 128   ;;  %s1679_s14 = smov 8  }
  0x51   : > { %1344 = dma.hbm_to_vmem [thread:$0]  (!%p1866_p2), %s257_s21, 4096, %s259_s28, %s248_s16, %s1678_s13, %s1678_s13, %s1679_s14  }
  0x52   : > { %270 = sbr.rel (%p1799_p11) target bundleno = 428 (0x1ac), region = 44 }
  0x57   : > { %s272_s20 = sand.u32 1, %s1647_s25  }
  0x58   : > { %s1246_s8 = sshll.u32 %s272_s20, 8  ;;  %s273_s9 = scalar_lea.sflag [#allocation3], %s272_s20 }
  0x59   : > { %s1877_s19 = scalar_lea.vmem [#allocation2], %s1246_s8 }
  0x5a   : > { %1618 = dma.done.wait (%p1783_p3), %s273_s9, 4096  }
  0x5b   : > { %1620 = vsyncadd (%p1783_p3), %s273_s9, 4294963200  ;;  %p2666_p8 = scmp.ne.s32.totalorder %s2652_s10, 0 }
  0x5d   : > { %1622 = dma.done.wait (%p2666_p8), [#allocation6], 704  }
  0x5e   : > { %1624 = vsyncadd (%p2666_p8), [#allocation6], 4294966592  ;;  %p348_p11 = scmp.eq.s32.totalorder %s1655_s27, 0  ;;  %v505_v0 = vlaneseq  ;;  %s1277_s5 = sshll.u32 %s1655_s27, 7  ;;  %v1451_v1 = vld [vmem:[#allocation7 + $0x18] sm:$0xff]   ;;  %v1452_v3 = vld [vmem:[#allocation7 + $0x10] sm:$0xff]  }
  0x5f   : > { %s1890_s21 = scalar_lea.vmem %s1877_s19, %s1277_s5 [#allocation2]  ;;  %1314 = vmatprep.subr.bf16.mxu1 %v1451_v1  ;;  %1290 = vmatprep.subr.bf16.mxu0 %v1451_v1  ;;  %vm380_vm0 = vcmask 1040384   ;;  %v1453_v4 = vld [vmem:[#allocation7 + $0x8] sm:$0xff]   ;;  %vm441_vm1 = vcmask 1046528   ;;  %v1454_v28 = vld [vmem:[#allocation7] sm:$0xff]   ;;  %v1948_v33 = vld [vmem:[#allocation5] sm:$0x7] }
  0x60   : > { %v506_v2 = vshrl.u32 %v505_v0, 7  ;;  %1318 = vmatpush3.bf16.msra.mxu1 %v1451_v1  ;;  %1291 = vmatpush3.bf16.msra.mxu0 %v1451_v1  ;;  %v1893_v5 = vld [vmem:[%s1890_s21 + $0x30] sm:$0xff]  ;;  %v1896_v6 = vld [vmem:[%s1890_s21 + $0x38] sm:$0xff]  ;;  %v1899_v7 = vld [vmem:[%s1890_s21 + $0x40] sm:$0xff]  ;;  %s1250_s28 = sshll.u32 %s1655_s27, 3  ;;  %vm908_vm2 = vcmask 523264  }
  0x61   : > { %1315 = vmatprep.subr.bf16.mxu1 %v1452_v3  ;;  %1292 = vmatprep.subr.bf16.mxu0 %v1452_v3  ;;  %2667 = vst [vmem:[#allocation18_spill] sm:$0xff] %v1899_v7  ;;  %v1908_v11 = vld [vmem:[%s1890_s21 + $0x48] sm:$0xff]  ;;  %v1911_v12 = vld [vmem:[%s1890_s21 + $0x50] sm:$0xff]  ;;  %v1914_v13 = vld [vmem:[%s1890_s21 + $0x58] sm:$0xff]  ;;  %v393_v14 = vrot.slane %v1893_v5, 7  ;;  %v394_v15 = vrot.slane %v1896_v6, 7 }
  0x62   : > { %v1901_v8 = vsub.s32 0, %v506_v2  ;;  %v1903_v9 = vsub.s32 1, %v506_v2  ;;  %v1905_v10 = vsub.s32 2, %v506_v2  ;;  %2668 = vst [vmem:[#allocation19_spill] sm:$0xff] %v1908_v11  ;;  %v396_v16 = vrot.slane %v1899_v7, 7  ;;  %v1920_v17 = vld [vmem:[%s1890_s21 + $0x60] sm:$0xff] }
  0x63   : > { %2669 = vst [vmem:[#allocation20_spill] sm:$0xff] %v1920_v17  ;;  %v1923_v18 = vld [vmem:[%s1890_s21 + $0x68] sm:$0xff]  ;;  %v1926_v19 = vld [vmem:[%s1890_s21 + $0x70] sm:$0xff]  ;;  %v397_v20 = vrot.slane %v1908_v11, 7  ;;  %v399_v21 = vrot.slane %v1911_v12, 7  ;;  %v400_v22 = vrot.slane %v1914_v13, 7  ;;  %v1935_v24 = vsel %vm380_vm0, %v393_v14, %v394_v15 }
  0x64   : > { %2670 = vst [vmem:[#allocation21_spill] sm:$0xff] %v1923_v18  ;;  %1319 = vmatpush3.bf16.msra.mxu1 %v1452_v3  ;;  %1293 = vmatpush3.bf16.msra.mxu0 %v1452_v3  ;;  %v1932_v23 = vld [vmem:[%s1890_s21 + $0x78] sm:$0xff]  ;;  %v402_v25 = vrot.slane %v1920_v17, 7  ;;  %v403_v26 = vrot.slane %v1923_v18, 7  ;;  %v405_v27 = vrot.slane %v1926_v19, 7  ;;  %v1946_v32 = vsel %vm380_vm0, 0.0, %v393_v14 }
  0x65   : > { %1316 = vmatprep.subr.bf16.mxu1 %v1453_v4  ;;  %1294 = vmatprep.subr.bf16.mxu0 %v1453_v4  ;;  %v1941_v29 = vsel %vm380_vm0, %v396_v16, %v397_v20  ;;  %v401_v30 = vsel %vm380_vm0, %v399_v21, %v400_v22  ;;  %v406_v31 = vrot.slane %v1932_v23, 7  ;;  %v1954_v35 = vsel %vm380_vm0, 0.0, %v396_v16  ;;  %v1960_v38 = vld [vmem:[#allocation5 + $0x4] sm:$0x7]  ;;  %v504_v59 = vld [vmem:[#allocation5 + $0x8] sm:$0x7] }
  0x66   : > { %2671 = vst [vmem:[#allocation22_spill] sm:$0xff] %v1941_v29  ;;  %v1951_v34 = vsel %vm380_vm0, %v402_v25, %v403_v26  ;;  %2673 = vst [vmem:[#allocation24_spill] sm:$0xff] %v1954_v35  ;;  %v437_v36 = vsel %vm380_vm0, 0.0, %v399_v21  ;;  %v1958_v37 = vsel %vm380_vm0, 0.0, %v402_v25  ;;  %v439_v40 = vsel %vm380_vm0, 0.0, %v405_v27  ;;  %s2039_s10 = sadd.s32 4294967295, %s1250_s28 }
  0x67   : > { %2672 = vst [vmem:[#allocation23_spill] sm:$0xff] %v1951_v34  ;;  %v407_v39 = vsel %vm380_vm0, %v405_v27, %v406_v31  ;;  %v454_v41 = vrot.slane %v1893_v5, 1  ;;  %v455_v42 = vrot.slane %v1896_v6, 1  ;;  %v457_v43 = vrot.slane %v1899_v7, 1  ;;  %p335_p3 = scmp.gt.s32.totalorder %s2039_s10, 0  ;;  %s2303_s3 = sadd.s32 8, %s1250_s28 }
  0x68   : > { %1320 = vmatpush3.bf16.msra.mxu1 %v1453_v4  ;;  %1295 = vmatpush3.bf16.msra.mxu0 %v1453_v4  ;;  %v458_v44 = vrot.slane %v1908_v11, 1  ;;  %v460_v45 = vrot.slane %v1911_v12, 1  ;;  %v461_v46 = vrot.slane %v1914_v13, 1  ;;  %v1978_v49 = vrot.slane %v1948_v33, %v1901_v8  ;;  %s1456_s24 = scalar_select %p348_p11, 0, 255 }
  0x69   : > { %1317 = vmatprep.subr.bf16.mxu1 %v1454_v28  ;;  %1296 = vmatprep.subr.bf16.mxu0 %v1454_v28  ;;  %v1971_v47 = vsel %vm441_vm1, %v454_v41, %v455_v42  ;;  %v1974_v48 = vsel %vm441_vm1, %v455_v42, 0.0  ;;  %v1982_v50 = vrot.slane %v1960_v38, %v1901_v8  ;;  %v2045_v25 = vrot.slane %v504_v59, %v1901_v8  ;;  %s2724_s10 = smov (!%p335_p3, %s2039_s10), 0  ;;  %p354_p10 = scmp.eq.s32.totalorder %s1655_s27, 1 }
  0x6a   : > { %2674 = vst [vmem:[#allocation25_spill] sm:$0xff] %v1971_v47  ;;  %2675 = vst [vmem:[#allocation26_spill] sm:$0xff] %v1974_v48  ;;  %v1985_v51 = vsel %vm441_vm1, %v457_v43, %v458_v44  ;;  %v1988_v52 = vsel %vm441_vm1, %v460_v45, %v461_v46  ;;  %v1991_v53 = vsel %vm441_vm1, %v458_v44, 0.0  ;;  %v1994_v54 = vsel %vm441_vm1, %v461_v46, 0.0  ;;  %s1253_s12 = sshll.u32 %s2724_s10, 4  ;;  %p342_p12 = scmp.lt.s32.totalorder %s2303_s3, 15 }
  0x6b   : > { %2676 = vst [vmem:[#allocation27_spill] sm:$0xff] %v1985_v51  ;;  %2677 = vst [vmem:[#allocation28_spill] sm:$0xff] %v1991_v53  ;;  %v517_v55 = vmul.f32 %v1978_v49, %v1946_v32  ;;  %v518_v56 = vmul.f32 %v1978_v49, %v1935_v24  ;;  %v2002_v57 = vmul.f32 %v1978_v49, %v1954_v35  ;;  %s2133_s15 = scalar_lea.vmem %s1877_s19, %s1253_s12 [#allocation2]  ;;  %s310_s14 = sand.u32 1, %s1635_s22  }
  0x6c   : > { %v2006_v58 = vmul.f32 %v1978_v49, %v1941_v29  ;;  %1321 = vmatpush3.bf16.msra.mxu1 %v1454_v28  ;;  %1297 = vmatpush3.bf16.msra.mxu0 %v1454_v28  ;;  %v521_v60 = vmul.f32 %v1978_v49, %v437_v36  ;;  %v522_v61 = vmul.f32 %v1978_v49, %v401_v30  ;;  %s2726_s3 = smov (!%p342_p12, %s2303_s3), 15  ;;  %s2698_s5 = sld [smem:[#allocation35_spill]] }
  0x6d   : > { %v2013_v62 = vmul.f32 %v1982_v50, %v1946_v32  ;;  %v2018_v0 = vmul.f32 %v1982_v50, %v1935_v24  ;;  %v553_v1 = vmul.f32 %v1982_v50, %v1954_v35  ;;  %v554_v2 = vmul.f32 %v1982_v50, %v1941_v29  ;;  %s1254_s11 = sshll.u32 %s2726_s3, 4  ;;  %s2699_s10 = sld [smem:[#allocation13_spill]] }
  0x6e   : > { %v2025_v3 = vmul.f32 %v1982_v50, %v437_v36  ;;  %v2028_v4 = vmul.f32 %v1982_v50, %v401_v30  ;;  %v557_v14 = vmul.f32 %v1982_v50, %v1958_v37  ;;  %v558_v15 = vmul.f32 %v1982_v50, %v1951_v34  ;;  %s1462_s18 = scalar_select %p354_p10, 0, 255 }
  0x6f   : > { %2678 = vst [vmem:[#allocation29_spill] sm:$0xff] %v2013_v62  ;;  %2679 = vst [vmem:[#allocation30_spill] sm:$0xff] %v2018_v0  ;;  %v2035_v16 = vmul.f32 %v1982_v50, %v439_v40  ;;  %v2042_v20 = vmul.f32 %v1982_v50, %v407_v39  ;;  %v569_v21 = vadd.f32 %v553_v1, %v517_v55  ;;  %s345_s13 = scalar_lea.vmem %s1877_s19, %s1254_s11 [#allocation2]  ;;  %s1271_s12 = sshll.u32 %s1655_s27, 4 }
  0x70   : > { %v570_v22 = vadd.f32 %v554_v2, %v518_v56  ;;  %v573_v26 = vadd.f32 %v557_v14, %v521_v60  ;;  %v574_v27 = vadd.f32 %v558_v15, %v522_v61  ;;  %v2049_v28 = vrot.slane %v1948_v33, %v1903_v9  ;;  %s2700_s27 = sld [smem:[#allocation15_spill]]  ;;  %s2555_s20 = scalar_lea.sflag [#allocation4], %s310_s14 }
  0x71   : > { %2680 = vst [vmem:[#allocation31_spill] sm:$0xff] %v2035_v16  ;;  %2681 = vst [vmem:[#allocation32_spill] sm:$0xff] %v2042_v20  ;;  %v2053_v31 = vrot.slane %v1960_v38, %v1903_v9  ;;  %v589_v41 = vmul.f32 %v2045_v25, %v437_v36  ;;  %v590_v42 = vmul.f32 %v2045_v25, %v401_v30  ;;  %s1680_s9 = smov [#allocation8]  }
  0x72   : > { %v593_v43 = vmul.f32 %v2045_v25, %v439_v40  ;;  %v594_v44 = vmul.f32 %v2045_v25, %v407_v39  ;;  %v625_v8 = vmul.f32 %v2049_v28, %v1893_v5  ;;  %v626_v45 = vmul.f32 %v2049_v28, %v1896_v6  ;;  %s1551_s19 = sshll.u32 %s1680_s9, 4  ;;  %s1552_s19 = int_to_ptr.vmem [resolvable:$false] %s1551_s19 }
  0x73   : > { %v629_v46 = vmul.f32 %v2049_v28, %v1911_v12  ;;  %v630_v36 = vmul.f32 %v2049_v28, %v1914_v13  ;;  %v605_v30 = vadd.f32 %v589_v41, %v569_v21  ;;  %v606_v55 = vadd.f32 %v590_v42, %v570_v22 }
  0x74   : > { %v609_v40 = vadd.f32 %v593_v43, %v573_v26  ;;  %v610_v56 = vadd.f32 %v594_v44, %v574_v27  ;;  %v661_v39 = vmul.f32 %v2053_v31, %v1899_v7  ;;  %v662_v60 = vmul.f32 %v2053_v31, %v1908_v11 }
  0x75   : > { %v665_v61 = vmul.f32 %v2053_v31, %v1920_v17  ;;  %v666_v1 = vmul.f32 %v2053_v31, %v1923_v18  ;;  %v641_v2 = vadd.f32 %v625_v8, %v605_v30  ;;  %v642_v14 = vadd.f32 %v626_v45, %v606_v55 }
  0x76   : > { %v645_v15 = vadd.f32 %v629_v46, %v609_v40  ;;  %v646_v63 = vadd.f32 %v630_v36, %v610_v56  ;;  %v2082_v21 = vrot.slane %v504_v59, %v1903_v9  ;;  %v2086_v22 = vrot.slane %v1948_v33, %v1905_v10  ;;  %p2702_p4 = scmp.ne.s32.totalorder %s2700_s27, 0 }
  0x77   : > { %v2090_v26 = vrot.slane %v1960_v38, %v1905_v10  ;;  %v2093_v27 = vrot.slane %v504_v59, %v1905_v10  ;;  %v677_v41 = vadd.f32 %v661_v39, %v641_v2  ;;  %v678_v42 = vadd.f32 %v662_v60, %v642_v14 }
  0x78   : > { %v681_v43 = vadd.f32 %v665_v61, %v645_v15  ;;  %v682_v44 = vadd.f32 %v666_v1, %v646_v63  ;;  %v697_v9 = vmul.f32 %v2082_v21, %v1911_v12  ;;  %v698_v8 = vmul.f32 %v2082_v21, %v1914_v13 }
  0x79   : > { %v701_v33 = vmul.f32 %v2082_v21, %v1926_v19  ;;  %v702_v38 = vmul.f32 %v2082_v21, %v1932_v23  ;;  %v733_v10 = vmul.f32 %v2086_v22, %v1971_v47  ;;  %v734_v59 = vmul.f32 %v2086_v22, %v1974_v48 }
  0x7a   : > { %v2109_v63 = vmul.f32 %v2086_v22, %v1985_v51  ;;  %v2113_v45 = vmul.f32 %v2086_v22, %v1991_v53  ;;  %v713_v46 = vadd.f32 %v697_v9, %v677_v41  ;;  %v714_v36 = vadd.f32 %v698_v8, %v678_v42 }
  0x7b   : > { %v717_v30 = vadd.f32 %v701_v33, %v681_v43  ;;  %v718_v55 = vadd.f32 %v702_v38, %v682_v44  ;;  %v737_v40 = vmul.f32 %v2086_v22, %v1988_v52  ;;  %v738_v56 = vmul.f32 %v2086_v22, %v1994_v54  ;;  %v2151_v38 = vld [vmem:[%s2617_s2] ss:$0 sm:$0xff] }
  0x7c   : > { %v769_v39 = vmul.f32 %v2090_v26, %v1985_v51  ;;  %v770_v60 = vmul.f32 %v2090_v26, %v1991_v53  ;;  %v749_v61 = vadd.f32 %v733_v10, %v713_v46  ;;  %v750_v1 = vadd.f32 %v734_v59, %v714_v36 }
  0x7d   : > { %v2126_v2 = vmul.f32 %v2090_v26, %v1988_v52  ;;  %v2130_v14 = vmul.f32 %v2090_v26, %v1994_v54  ;;  %v2135_v15 = vadd.f32 %v737_v40, %v717_v30  ;;  %v2137_v41 = vadd.f32 %v738_v56, %v718_v55  ;;  %v2174_v56 = vld [vmem:[%s2133_s15] sm:%s1456_s24] }
  0x7e   : > { %v805_v42 = vmul.f32 %v2093_v27, %v1988_v52  ;;  %v806_v43 = vmul.f32 %v2093_v27, %v1994_v54  ;;  %v785_v44 = vadd.f32 %v769_v39, %v749_v61  ;;  %v786_v9 = vadd.f32 %v770_v60, %v750_v1 }
  0x7f   : > { %v464_v8 = vrot.slane %v1923_v18, 1  ;;  %v571_v33 = vadd.f32 %v2025_v3, %v2002_v57  ;;  %v572_v52 = vadd.f32 %v2028_v4, %v2006_v58  ;;  %v591_v54 = vmul.f32 %v2045_v25, %v1958_v37 }
  0x80   : > { %v592_v10 = vmul.f32 %v2045_v25, %v1951_v34  ;;  %v627_v59 = vmul.f32 %v2049_v28, %v1899_v7  ;;  %v821_v57 = vadd.f32 %v805_v42, %v785_v44  ;;  %v822_v3 = vadd.f32 %v806_v43, %v786_v9  ;;  %v2183_v42 = vld [vmem:[%s1890_s21] sm:$0xff]  ;;  %v2186_v43 = vld [vmem:[%s2133_s15 + $0x8] sm:%s1456_s24]  ;;  %s1272_s15 = sshll.u32 %s2699_s10, 5 }
  0x81   : > { %v2682_v46 = vrot.slane %v1920_v17, 1  ;;  %v2167_v58 = vsel %vm441_vm1, %v464_v8, 0.0  ;;  %v607_v4 = vadd.f32 %v591_v54, %v571_v33  ;;  %v628_v55 = vmul.f32 %v2049_v28, %v1908_v11  ;;  %v2193_v33 = vld [vmem:[%s1890_s21 + $0x8] sm:$0xff]  ;;  %s1121_s24 = sadd.s32 %s1272_s15, %s1271_s12 }
  0x82   : > { %v608_v30 = vadd.f32 %v592_v10, %v572_v52  ;;  %v663_v40 = vmul.f32 %v2053_v31, %v1911_v12  ;;  %v844_v39 = vadd.f32 %v2151_v38, %v821_v57  ;;  %v845_v60 = vadd.f32 %v2151_v38, %v822_v3  ;;  %v2196_v52 = vld [vmem:[%s1890_s21 + $0x10] sm:$0xff]  ;;  %v2204_v3 = vld [vmem:[%s1890_s21 + $0x20] sm:$0xff]  ;;  %s1273_s16 = sshll.u32 %s1121_s24, 7 }
  0x83   : > { %v2164_v36 = vsel %vm441_vm1, %v2682_v46, %v464_v8  ;;  %v664_v61 = vmul.f32 %v2053_v31, %v1914_v13  ;;  %v699_v1 = vmul.f32 %v2082_v21, %v1920_v17  ;;  %v643_v44 = vadd.f32 %v627_v59, %v607_v4  ;;  %v2199_v13 = vld [vmem:[%s1890_s21 + $0x18] sm:$0xff] }
  0x84   : > { %v644_v12 = vadd.f32 %v628_v55, %v608_v30  ;;  %v700_v9 = vmul.f32 %v2082_v21, %v1923_v18  ;;  %v807_v8 = vmul.f32 %v2093_v27, %v2164_v36  ;;  %v860_v54 = vmax.f32 %v844_v39, 0.0  ;;  %v2208_v30 = vld [vmem:[%s1890_s21 + $0x28] sm:$0xff]  ;;  %s1249_s21 = sshll.u32 %s310_s14, 7 }
  0x85   : > { %v861_v10 = vmax.f32 %v845_v60, 0.0  ;;  %v808_v57 = vmul.f32 %v2093_v27, %v2167_v58  ;;  %v381_v59 = vrot.slane %v2174_v56, 7  ;;  %v679_v46 = vadd.f32 %v663_v40, %v643_v44  ;;  %s2498_s28 = scalar_lea.vmem [#allocation8], %s1249_s21 }
  0x86   : > { %v680_v4 = vadd.f32 %v664_v61, %v644_v12  ;;  %v382_v55 = vrot.slane %v2186_v43, 7  ;;  %v384_v53 = vrot.slane %v2183_v42, 7  ;;  %v385_v11 = vrot.slane %v2193_v33, 7  ;;  %s1124_s1 = sshll.u32 %s2498_s28, 4  ;;  %s2549_s1 = int_to_ptr.vmem [resolvable:$true] %s1124_s1 }
  0x87   : > { %v872_v51 = vpack.c.bf16 %v861_v10, %v860_v54  ;;  %v387_v39 = vrot.slane %v2196_v52, 7  ;;  %v388_v60 = vrot.slane %v2199_v13, 7  ;;  %v715_v7 = vadd.f32 %v699_v1, %v679_v46  ;;  %s1547_s8 = scalar_lea.vmem %s2549_s1, 2048  ;;  %p1554_p1 = scmp.lt.s32.totalorder %s2549_s1, %s1552_s19 }
  0x88   : > { %v716_v0 = vadd.f32 %v700_v9, %v680_v4  ;;  %v383_v62 = vsel %vm380_vm0, %v381_v59, %v382_v55  ;;  %v390_v40 = vrot.slane %v2204_v3, 7  ;;  %v386_v61 = vsel %vm380_vm0, %v384_v53, %v385_v11  ;;  %p1548_p2 = scmp.ne.s32.totalorder %s2549_s1, %s1547_s8 }
  0x89   : > { %1306 = vmatprep.mubr.msk.bf16.mxu1 %vm908_vm2, %v872_v51  ;;  %v389_v44 = vsel %vm380_vm0, %v387_v39, %v388_v60  ;;  %v391_v12 = vrot.slane %v2208_v30, 7  ;;  %v431_v54 = vsel %vm380_vm0, 0.0, %v381_v59  ;;  %v751_v10 = vadd.f32 %v2109_v63, %v715_v7 }
  0x8a   : > { %v752_v29 = vadd.f32 %v2113_v45, %v716_v0  ;;  %v432_v1 = vsel %vm380_vm0, 0.0, %v384_v53  ;;  %v433_v9 = vsel %vm380_vm0, 0.0, %v387_v39  ;;  %v2230_v51 = vsel %vm380_vm0, 0.0, %v390_v40  ;;  %p1549_p6 = pnand %p1548_p2, %p2702_p4 }
  0x8b   : > { %v2227_v46 = vsel %vm380_vm0, %v390_v40, %v391_v12  ;;  %v442_v11 = vrot.slane %v2174_v56, 1  ;;  %v443_v4 = vrot.slane %v2186_v43, 1  ;;  %v787_v59 = vadd.f32 %v2126_v2, %v751_v10 }
  0x8c   : > { %v788_v7 = vadd.f32 %v2130_v14, %v752_v29  ;;  %v445_v0 = vrot.slane %v2183_v42, 1  ;;  %v446_v53 = vrot.slane %v2193_v33, 1  ;;  %v448_v45 = vrot.slane %v2196_v52, 1  ;;  %p1550_p5 = pneg %p1549_p6 }
  0x8d   : > { %v2239_v63 = vsel %vm441_vm1, %v442_v11, %v443_v4  ;;  %v449_v55 = vrot.slane %v2199_v13, 1  ;;  %v2244_v39 = vsel %vm441_vm1, %v443_v4, 0.0  ;;  %v823_v60 = vadd.f32 %v807_v8, %v787_v59 }
  0x8e   : > { %v824_v40 = vadd.f32 %v808_v57, %v788_v7  ;;  %v2247_v2 = vsel %vm441_vm1, %v445_v0, %v446_v53  ;;  %v2250_v29 = vsel %vm441_vm1, %v446_v53, 0.0  ;;  %v509_v10 = vmul.f32 %v1978_v49, %v431_v54 }
  0x8f   : > { %v2253_v14 = vsel %vm441_vm1, %v448_v45, %v449_v55  ;;  %v2256_v12 = vsel %vm441_vm1, %v449_v55, 0.0  ;;  %v510_v11 = vmul.f32 %v1978_v49, %v383_v62  ;;  %v846_v4 = vadd.f32 %v2151_v38, %v823_v60 }
  0x90   : > { %v847_v8 = vadd.f32 %v2151_v38, %v824_v40  ;;  %v511_v57 = vmul.f32 %v1978_v49, %v432_v1  ;;  %v512_v59 = vmul.f32 %v1978_v49, %v386_v61  ;;  %v513_v7 = vmul.f32 %v1978_v49, %v433_v9 }
  0x91   : > { %v514_v0 = vmul.f32 %v1978_v49, %v389_v44  ;;  %v545_v53 = vmul.f32 %v1982_v50, %v432_v1  ;;  %v546_v45 = vmul.f32 %v1982_v50, %v386_v61  ;;  %v862_v55 = vmax.f32 %v846_v4, 0.0 }
  0x92   : > { %v863_v54 = vmax.f32 %v847_v8, 0.0  ;;  %v547_v62 = vmul.f32 %v1982_v50, %v433_v9  ;;  %v548_v60 = vmul.f32 %v1982_v50, %v389_v44  ;;  %v549_v40 = vmul.f32 %v1982_v50, %v2230_v51 }
  0x93   : > { %v550_v35 = vmul.f32 %v1982_v50, %v2227_v46  ;;  %v561_v48 = vadd.f32 %v545_v53, %v509_v10  ;;  %v562_v47 = vadd.f32 %v546_v45, %v510_v11  ;;  %v581_v1 = vmul.f32 %v2045_v25, %v433_v9 }
  0x94   : > { %v873_v18 = vpack.c.bf16 %v863_v54, %v862_v55  ;;  %v563_v17 = vadd.f32 %v547_v62, %v511_v57  ;;  %v564_v20 = vadd.f32 %v548_v60, %v512_v59  ;;  %v565_v61 = vadd.f32 %v549_v40, %v513_v7 }
  0x95   : > { %v566_v4 = vadd.f32 %v550_v35, %v514_v0  ;;  %v582_v8 = vmul.f32 %v2045_v25, %v389_v44  ;;  %v583_v16 = vmul.f32 %v2045_v25, %v2230_v51  ;;  %v584_v34 = vmul.f32 %v2045_v25, %v2227_v46 }
  0x96   : > { %1307 = vmatmul.mubr.msk.bf16.vlgmr.msra.gmra.mxu1 %vm908_vm2, %v873_v18  ;;  %v585_v50 = vmul.f32 %v2045_v25, %v1946_v32  ;;  %v586_v10 = vmul.f32 %v2045_v25, %v1935_v24  ;;  %v597_v11 = vadd.f32 %v581_v1, %v561_v48  ;;  %v617_v44 = vmul.f32 %v2174_v56, %v2049_v28 }
  0x97   : > { %v598_v9 = vadd.f32 %v582_v8, %v562_v47  ;;  %v599_v35 = vadd.f32 %v583_v16, %v563_v17  ;;  %v618_v18 = vmul.f32 %v2186_v43, %v2049_v28  ;;  %v600_v57 = vadd.f32 %v584_v34, %v564_v20 }
  0x98   : > { %v601_v59 = vadd.f32 %v585_v50, %v565_v61  ;;  %v602_v7 = vadd.f32 %v586_v10, %v566_v4  ;;  %v619_v32 = vmul.f32 %v2049_v28, %v2183_v42  ;;  %v620_v24 = vmul.f32 %v2049_v28, %v2193_v33 }
  0x99   : > { %v621_v47 = vmul.f32 %v2049_v28, %v2196_v52  ;;  %v622_v17 = vmul.f32 %v2049_v28, %v2199_v13  ;;  %v633_v48 = vadd.f32 %v617_v44, %v597_v11  ;;  %v634_v16 = vadd.f32 %v618_v18, %v598_v9 }
  0x9a   : > { %v635_v56 = vadd.f32 %v619_v32, %v599_v35  ;;  %v653_v34 = vmul.f32 %v2053_v31, %v2183_v42  ;;  %v654_v20 = vmul.f32 %v2053_v31, %v2193_v33  ;;  %v636_v43 = vadd.f32 %v620_v24, %v600_v57 }
  0x9b   : > { %v637_v0 = vadd.f32 %v621_v47, %v601_v59  ;;  %v638_v53 = vadd.f32 %v622_v17, %v602_v7  ;;  %v655_v45 = vmul.f32 %v2053_v31, %v2196_v52  ;;  %v656_v55 = vmul.f32 %v2053_v31, %v2199_v13 }
  0x9c   : > { %v657_v42 = vmul.f32 %v2053_v31, %v2204_v3  ;;  %v658_v33 = vmul.f32 %v2053_v31, %v2208_v30  ;;  %v669_v54 = vadd.f32 %v653_v34, %v633_v48  ;;  %v670_v62 = vadd.f32 %v654_v20, %v634_v16 }
  0x9d   : > { %v671_v60 = vadd.f32 %v655_v45, %v635_v56  ;;  %v689_v40 = vmul.f32 %v2082_v21, %v2196_v52  ;;  %v690_v1 = vmul.f32 %v2082_v21, %v2199_v13  ;;  %v672_v61 = vadd.f32 %v656_v55, %v636_v43 }
  0x9e   : > { %v673_v4 = vadd.f32 %v657_v42, %v637_v0  ;;  %v674_v8 = vadd.f32 %v658_v33, %v638_v53  ;;  %v691_v50 = vmul.f32 %v2082_v21, %v2204_v3  ;;  %v692_v10 = vmul.f32 %v2082_v21, %v2208_v30 }
  0x9f   : > { %v693_v11 = vmul.f32 %v2082_v21, %v1893_v5  ;;  %v694_v52 = vmul.f32 %v2082_v21, %v1896_v6  ;;  %v705_v9 = vadd.f32 %v689_v40, %v669_v54  ;;  %v706_v13 = vadd.f32 %v690_v1, %v670_v62 }
  0xa0   : > { %v707_v35 = vadd.f32 %v691_v50, %v671_v60  ;;  %v725_v44 = vmul.f32 %v2086_v22, %v2239_v63  ;;  %v726_v18 = vmul.f32 %v2086_v22, %v2244_v39  ;;  %v708_v57 = vadd.f32 %v692_v10, %v672_v61 }
  0xa1   : > { %v709_v59 = vadd.f32 %v693_v11, %v673_v4  ;;  %v710_v7 = vadd.f32 %v694_v52, %v674_v8  ;;  %v727_v32 = vmul.f32 %v2086_v22, %v2247_v2  ;;  %v728_v24 = vmul.f32 %v2086_v22, %v2250_v29 }
  0xa2   : > { %v729_v47 = vmul.f32 %v2086_v22, %v2253_v14  ;;  %v730_v63 = vmul.f32 %v2086_v22, %v2256_v12  ;;  %v741_v39 = vadd.f32 %v725_v44, %v705_v9  ;;  %v742_v17 = vadd.f32 %v726_v18, %v706_v13 }
  0xa3   : > { %v743_v48 = vadd.f32 %v727_v32, %v707_v35  ;;  %v761_v16 = vmul.f32 %v2090_v26, %v2247_v2  ;;  %v762_v56 = vmul.f32 %v2090_v26, %v2250_v29  ;;  %v744_v34 = vadd.f32 %v728_v24, %v708_v57  ;;  %v1466_v32 = vld [vmem:[%s345_s13 + $0x8] sm:%s1462_s18] }
  0xa4   : > { %v2348_v20 = vadd.f32 %v729_v47, %v709_v59  ;;  %v2350_v43 = vadd.f32 %v730_v63, %v710_v7  ;;  %v763_v0 = vmul.f32 %v2090_v26, %v2253_v14  ;;  %v764_v53 = vmul.f32 %v2090_v26, %v2256_v12  ;;  %v1463_v7 = vld [vmem:[%s345_s13] sm:%s1462_s18]  ;;  %s2701_s18 = sld [smem:[#allocation36_spill]] }
  0xa5   : > { %v777_v45 = vadd.f32 %v761_v16, %v741_v39  ;;  %v778_v55 = vadd.f32 %v762_v56, %v742_v17  ;;  %v797_v2 = vmul.f32 %v2093_v27, %v2253_v14  ;;  %v798_v29 = vmul.f32 %v2093_v27, %v2256_v12 }
  0xa6   : > { %v451_v42 = vrot.slane %v2204_v3, 1  ;;  %v452_v33 = vrot.slane %v2208_v30, 1  ;;  %v779_v54 = vadd.f32 %v763_v0, %v743_v48  ;;  %v780_v60 = vadd.f32 %v764_v53, %v744_v34 }
  0xa7   : > { %v813_v62 = vadd.f32 %v797_v2, %v777_v45  ;;  %v466_v40 = vrot.slane %v1926_v19, 1  ;;  %v467_v1 = vrot.slane %v1932_v23, 1  ;;  %v814_v61 = vadd.f32 %v798_v29, %v778_v55 }
  0xa8   : > { %v2368_v14 = vsel %vm441_vm1, %v451_v42, %v452_v33  ;;  %v2371_v4 = vsel %vm441_vm1, %v452_v33, 0.0  ;;  %v773_v12 = vmul.f32 %v2090_v26, %v2164_v36  ;;  %v774_v13 = vmul.f32 %v2090_v26, %v2167_v58 }
  0xa9   : > { %v836_v8 = vadd.f32 %v2151_v38, %v813_v62  ;;  %v799_v50 = vmul.f32 %v2093_v27, %v2368_v14  ;;  %v800_v10 = vmul.f32 %v2093_v27, %v2371_v4  ;;  %v468_v11 = vsel %vm441_vm1, %v466_v40, %v467_v1 }
  0xaa   : > { %v837_v52 = vadd.f32 %v2151_v38, %v814_v61  ;;  %v500_v9 = vsel %vm441_vm1, %v467_v1, 0.0  ;;  %v789_v35 = vadd.f32 %v773_v12, %v2135_v15  ;;  %v809_v59 = vmul.f32 %v2093_v27, %v468_v11  ;;  %s2547_s13 = scalar_lea.hbm %s2701_s18, %s1273_s16 }
  0xab   : > { %v852_v44 = vmax.f32 %v836_v8, 0.0  ;;  %v815_v18 = vadd.f32 %v799_v50, %v779_v54  ;;  %v816_v57 = vadd.f32 %v800_v10, %v780_v60  ;;  %v790_v47 = vadd.f32 %v774_v13, %v2137_v41  ;;  %v2683_v60 = vld [vmem:[#allocation23_spill] sm:$0xff] }
  0xac   : > { %v853_v24 = vmax.f32 %v837_v52, 0.0  ;;  %v810_v63 = vmul.f32 %v2093_v27, %v500_v9  ;;  %v825_v48 = vadd.f32 %v809_v59, %v789_v35  ;;  %v408_v15 = vrot.slane %v1463_v7, 7  ;;  %v2684_v50 = vld [vmem:[#allocation31_spill] sm:$0xff]  ;;  %v2685_v52 = vld [vmem:[#allocation32_spill] sm:$0xff] }
  0xad   : > { %v838_v39 = vadd.f32 %v2151_v38, %v815_v18  ;;  %v839_v17 = vadd.f32 %v2151_v38, %v816_v57  ;;  %v409_v34 = vrot.slane %v1466_v32, 7  ;;  %v469_v55 = vrot.slane %v1463_v7, 1  ;;  %v2687_v57 = vld [vmem:[#allocation21_spill] sm:$0xff] }
  0xae   : > { %v868_v16 = vpack.c.bf16 %v853_v24, %v852_v44  ;;  %v826_v56 = vadd.f32 %v810_v63, %v790_v47  ;;  %v848_v45 = vadd.f32 %v2151_v38, %v825_v48  ;;  %v440_v29 = vsel %vm380_vm0, 0.0, %v408_v15  ;;  %v2686_v44 = vld [vmem:[#allocation20_spill] sm:$0xff] }
  0xaf   : > { %v854_v0 = vmax.f32 %v838_v39, 0.0  ;;  %v855_v53 = vmax.f32 %v839_v17, 0.0  ;;  %v410_v2 = vsel %vm380_vm0, %v408_v15, %v409_v34  ;;  %v470_v42 = vrot.slane %v1466_v32, 1 }
  0xb0   : > { %1298 = vmatprep.mubr.msk.bf16.mxu0 %vm908_vm2, %v868_v16  ;;  %v849_v41 = vadd.f32 %v2151_v38, %v826_v56  ;;  %v864_v54 = vmax.f32 %v848_v45, 0.0  ;;  %v523_v62 = vmul.f32 %v1978_v49, %v1958_v37  ;;  %v524_v40 = vmul.f32 %v1978_v49, %v2683_v60 }
  0xb1   : > { %v869_v33 = vpack.c.bf16 %v855_v53, %v854_v0  ;;  %v471_v61 = vsel %vm441_vm1, %v469_v55, %v470_v42  ;;  %v501_v12 = vsel %vm441_vm1, %v470_v42, 0.0  ;;  %v595_v8 = vmul.f32 %v2045_v25, %v440_v29 }
  0xb2   : > { %v865_v1 = vmax.f32 %v849_v41, 0.0  ;;  %v575_v10 = vadd.f32 %v2684_v50, %v523_v62  ;;  %v576_v13 = vadd.f32 %v2685_v52, %v524_v40  ;;  %v596_v35 = vmul.f32 %v2045_v25, %v410_v2  ;;  %v2691_v62 = vld [vmem:[#allocation22_spill] sm:$0xff] }
  0xb3   : > { %1299 = vmatmul.mubr.msk.bf16.vlgmr.msra.gmra.mxu0 %vm908_vm2, %v869_v33  ;;  %v631_v37 = vmul.f32 %v2049_v28, %v2686_v44  ;;  %v632_v59 = vmul.f32 %v2049_v28, %v2687_v57  ;;  %v667_v24 = vmul.f32 %v2053_v31, %v1926_v19  ;;  %v668_v47 = vmul.f32 %v2053_v31, %v1932_v23  ;;  %v2690_v33 = vld [vmem:[#allocation24_spill] sm:$0xff] }
  0xb4   : > { %v874_v18 = vpack.c.bf16 %v865_v1, %v864_v54  ;;  %v611_v63 = vadd.f32 %v595_v8, %v575_v10  ;;  %v612_v39 = vadd.f32 %v596_v35, %v576_v13  ;;  %v703_v17 = vmul.f32 %v1463_v7, %v2082_v21  ;;  %v2693_v8 = vld [vmem:[#allocation30_spill] sm:$0xff] }
  0xb5   : > { %v704_v48 = vmul.f32 %v1466_v32, %v2082_v21  ;;  %v739_v16 = vmul.f32 %v2086_v22, %v2164_v36  ;;  %v740_v56 = vmul.f32 %v2086_v22, %v2167_v58  ;;  %v775_v15 = vmul.f32 %v2090_v26, %v468_v11  ;;  %v2688_v36 = vld [vmem:[#allocation25_spill] sm:$0xff]  ;;  %v2689_v58 = vld [vmem:[#allocation26_spill] sm:$0xff] }
  0xb6   : > { %1310 = vmatprep.mubr.msk.bf16.mxu1 %vm908_vm2, %v874_v18  ;;  %v776_v19 = vmul.f32 %v2090_v26, %v500_v9  ;;  %v647_v34 = vadd.f32 %v631_v37, %v611_v63  ;;  %v648_v23 = vadd.f32 %v632_v59, %v612_v39  ;;  %v811_v0 = vmul.f32 %v2093_v27, %v471_v61  ;;  %v2692_v61 = vld [vmem:[#allocation29_spill] sm:$0xff]  ;;  %v2695_v63 = vld [vmem:[#allocation19_spill] sm:$0xff] }
  0xb7   : > { %v812_v7 = vmul.f32 %v2093_v27, %v501_v12  ;;  %v765_v32 = vmul.f32 %v2090_v26, %v2368_v14  ;;  %v766_v53 = vmul.f32 %v2090_v26, %v2371_v4  ;;  %v801_v45 = vmul.f32 %v2093_v27, %v2688_v36 }
  0xb8   : > { %v802_v11 = vmul.f32 %v2093_v27, %v2689_v58  ;;  %v683_v55 = vadd.f32 %v667_v24, %v647_v34  ;;  %v684_v9 = vadd.f32 %v668_v47, %v648_v23  ;;  %v515_v41 = vmul.f32 %v1978_v49, %v2230_v51 }
  0xb9   : > { %v516_v2 = vmul.f32 %v1978_v49, %v2227_v46  ;;  %v781_v29 = vadd.f32 %v765_v32, %v2348_v20  ;;  %v782_v42 = vadd.f32 %v766_v53, %v2350_v43  ;;  %v587_v54 = vmul.f32 %v2045_v25, %v2690_v33  ;;  %v2697_v32 = vld [vmem:[#allocation28_spill] sm:$0xff] }
  0xba   : > { %v588_v60 = vmul.f32 %v2045_v25, %v2691_v62  ;;  %v719_v40 = vadd.f32 %v703_v17, %v683_v55  ;;  %v720_v1 = vadd.f32 %v704_v48, %v684_v9  ;;  %v567_v12 = vadd.f32 %v2692_v61, %v515_v41  ;;  %v2484_v33 = vld [vmem:[%s2619_s4] ss:$0 sm:$0xff] }
  0xbb   : > { %v568_v50 = vadd.f32 %v2693_v8, %v516_v2  ;;  %v817_v51 = vadd.f32 %v801_v45, %v781_v29  ;;  %v818_v10 = vadd.f32 %v802_v11, %v782_v42  ;;  %v623_v49 = vmul.f32 %v2049_v28, %v2204_v3  ;;  %v2489_v62 = vld [vmem:[%s2698_s5] ss:$0 sm:$0xff]  ;;  %s1553_s5 = scalar_lea.vmem %s1552_s19, 4096 }
  0xbc   : > { %v624_v46 = vmul.f32 %v2049_v28, %v2208_v30  ;;  %v755_v20 = vadd.f32 %v739_v16, %v719_v40  ;;  %v756_v43 = vadd.f32 %v740_v56, %v720_v1  ;;  %v603_v52 = vadd.f32 %v587_v54, %v567_v12  ;;  %v2694_v30 = vld [vmem:[#allocation18_spill] sm:$0xff]  ;;  %p1555_p7 = scmp.lt.s32.totalorder %s1553_s5, %s1547_s8 }
  0xbd   : > { %v604_v13 = vadd.f32 %v588_v60, %v568_v50  ;;  %v840_v25 = vadd.f32 %v2151_v38, %v817_v51  ;;  %v841_v35 = vadd.f32 %v2151_v38, %v818_v10  ;;  %v659_v44 = vmul.f32 %v2053_v31, %v1893_v5 }
  0xbe   : > { %v660_v37 = vmul.f32 %v2053_v31, %v1896_v6  ;;  %v791_v18 = vadd.f32 %v775_v15, %v755_v20  ;;  %v792_v57 = vadd.f32 %v776_v19, %v756_v43  ;;  %v639_v3 = vadd.f32 %v623_v49, %v603_v52  ;;  %p1556_p9 = por %p1555_p7, %p1554_p1 }
  0xbf   : > { %v640_v59 = vadd.f32 %v624_v46, %v604_v13  ;;  %v856_v24 = vmax.f32 %v840_v25, 0.0  ;;  %v857_v28 = vmax.f32 %v841_v35, 0.0  ;;  %v695_v47 = vmul.f32 %v2082_v21, %v2694_v30 }
  0xc0   : > { %v696_v39 = vmul.f32 %v2082_v21, %v2695_v63  ;;  %v827_v17 = vadd.f32 %v811_v0, %v791_v18  ;;  %v828_v48 = vadd.f32 %v812_v7, %v792_v57  ;;  %v675_v16 = vadd.f32 %v659_v44, %v639_v3  ;;  %v2696_v7 = vld [vmem:[#allocation27_spill] sm:$0xff]  ;;  %p1557_p13 = pnand %p1556_p9, %p1550_p5 }
  0xc1   : > { %v676_v56 = vadd.f32 %v660_v37, %v640_v59  ;;  %v870_v5 = vpack.c.bf16 %v857_v28, %v856_v24  ;;  %v731_v6 = vmul.f32 %v2086_v22, %v2368_v14  ;;  %v732_v31 = vmul.f32 %v2086_v22, %v2371_v4 }
  0xc2   : > { %v767_v15 = vmul.f32 %v2090_v26, %v2688_v36  ;;  %v850_v19 = vadd.f32 %v2151_v38, %v827_v17  ;;  %v851_v34 = vadd.f32 %v2151_v38, %v828_v48  ;;  %v711_v23 = vadd.f32 %v695_v47, %v675_v16 }
  0xc3   : > { %v712_v21 = vadd.f32 %v696_v39, %v676_v56  ;;  %1302 = vmatprep.mubr.msk.bf16.mxu0 %vm908_vm2, %v870_v5  ;;  %v768_v0 = vmul.f32 %v2090_v26, %v2689_v58  ;;  %v803_v14 = vmul.f32 %v2093_v27, %v2696_v7  ;;  %v804_v22 = vmul.f32 %v2093_v27, %v2697_v32 }
  0xc4   : > { %v866_v4 = vmax.f32 %v850_v19, 0.0  ;;  %v867_v53 = vmax.f32 %v851_v34, 0.0  ;;  %v747_v36 = vadd.f32 %v731_v6, %v711_v23 }
  0xc5   : > { %v748_v45 = vadd.f32 %v732_v31, %v712_v21 }
  0xc6   : > { %v875_v11 = vpack.c.bf16 %v867_v53, %v866_v4  ;;  %v783_v55 = vadd.f32 %v767_v15, %v747_v36 }
  0xc7   : > { %v784_v9 = vadd.f32 %v768_v0, %v748_v45 }
  0xc8   : > { %1311 = vmatmul.mubr.msk.bf16.gmra.mxu1 %vm908_vm2, %v875_v11  ;;  %v819_v41 = vadd.f32 %v803_v14, %v783_v55 }
  0xc9   : > { %v820_v2 = vadd.f32 %v804_v22, %v784_v9 }
  0xca   : > { %v842_v26 = vadd.f32 %v2151_v38, %v819_v41 }
  0xcb   : > { %v843_v58 = vadd.f32 %v2151_v38, %v820_v2 }
  0xcc   : > { %v858_v29 = vmax.f32 %v842_v26, 0.0 }
  0xcd   : > { %v859_v42 = vmax.f32 %v843_v58, 0.0 }
  0xcf   : > { %v871_v27 = vpack.c.bf16 %v859_v42, %v858_v29 }
  0xd1   : > { %1303 = vmatmul.mubr.msk.bf16.gmra.mxu0 %vm908_vm2, %v871_v27 }
 0x156   : > { %v1308_v54 = vpop.f32.mrf.mxu1 }
 0x157   : > { %v1047_v38 = vmul.f32 %v1308_v54, %v2484_v33 }
 0x158   : > { %v999_v60 = vpop.f32.mrf.mxu1 }
 0x159   : > { %v1070_v40 = vadd.f32 %v2489_v62, %v1047_v38  ;;  %v1045_v1 = vmul.f32 %v2484_v33, %v999_v60 }
 0x15a   : > { %v1309_v61 = vpop.f32.mrf.mxu1 }
 0x15b   : > { %v1086_v12 = vmax.f32 %v1070_v40, 0.0  ;;  %v1068_v8 = vadd.f32 %v2489_v62, %v1045_v1  ;;  %v1048_v50 = vmul.f32 %v1309_v61, %v2484_v33 }
 0x15c   : > { %v1002_v51 = vpop.f32.mrf.mxu1 }
 0x15d   : > { %1102 = vst [vmem:[%s2498_s28 + $0x50] sm:$0xff] %v1086_v12  ;;  %v1084_v10 = vmax.f32 %v1068_v8, 0.0  ;;  %v1071_v49 = vadd.f32 %v2489_v62, %v1048_v50  ;;  %v1046_v46 = vmul.f32 %v2484_v33, %v1002_v51 }
 0x15f   : > { %1100 = vst [vmem:[%s2498_s28 + $0x40] sm:$0xff] %v1084_v10  ;;  %v1087_v20 = vmax.f32 %v1071_v49, 0.0  ;;  %v1069_v43 = vadd.f32 %v2489_v62, %v1046_v46 }
 0x161   : > { %1103 = vst [vmem:[%s2498_s28 + $0x58] sm:$0xff] %v1087_v20  ;;  %v1085_v52 = vmax.f32 %v1069_v43, 0.0 }
 0x163   : > { %1101 = vst [vmem:[%s2498_s28 + $0x48] sm:$0xff] %v1085_v52 }
 0x173   : > { %v1300_v13 = vpop.f32.mrf.mxu0 }
 0x174   : > { %v1039_v25 = vmul.f32 %v1300_v13, %v2484_v33 }
 0x175   : > { %v967_v35 = vpop.f32.mrf.mxu0 }
 0x176   : > { %v1062_v44 = vadd.f32 %v2489_v62, %v1039_v25  ;;  %v1037_v37 = vmul.f32 %v2484_v33, %v967_v35 }
 0x177   : > { %v1301_v18 = vpop.f32.mrf.mxu0 }
 0x178   : > { %v1078_v57 = vmax.f32 %v1062_v44, 0.0  ;;  %v1060_v3 = vadd.f32 %v2489_v62, %v1037_v37  ;;  %v1040_v59 = vmul.f32 %v1301_v18, %v2484_v33 }
 0x179   : > { %v970_v24 = vpop.f32.mrf.mxu0 }
 0x17a   : > { %1094 = vst [vmem:[%s2498_s28 + $0x10] sm:$0xff] %v1078_v57  ;;  %v1076_v28 = vmax.f32 %v1060_v3, 0.0  ;;  %v1063_v30 = vadd.f32 %v2489_v62, %v1040_v59  ;;  %v1038_v47 = vmul.f32 %v2484_v33, %v970_v24 }
 0x17c   : > { %1092 = vst [vmem:[%s2498_s28] sm:$0xff] %v1076_v28  ;;  %v1079_v63 = vmax.f32 %v1063_v30, 0.0  ;;  %v1061_v39 = vadd.f32 %v2489_v62, %v1038_v47 }
 0x17e   : > { %1095 = vst [vmem:[%s2498_s28 + $0x18] sm:$0xff] %v1079_v63  ;;  %v1077_v17 = vmax.f32 %v1061_v39, 0.0 }
 0x180   : > { %1093 = vst [vmem:[%s2498_s28 + $0x8] sm:$0xff] %v1077_v17 }
 0x188   : > { %v1312_v48 = vpop.f32.mrf.mxu1 }
 0x189   : > { %v1051_v16 = vmul.f32 %v1312_v48, %v2484_v33 }
 0x18a   : > { %v1015_v56 = vpop.f32.mrf.mxu1 }
 0x18b   : > { %v1074_v5 = vadd.f32 %v2489_v62, %v1051_v16  ;;  %v1049_v6 = vmul.f32 %v2484_v33, %v1015_v56 }
 0x18c   : > { %v1313_v31 = vpop.f32.mrf.mxu1 }
 0x18d   : > { %v1090_v15 = vmax.f32 %v1074_v5, 0.0  ;;  %v1072_v19 = vadd.f32 %v2489_v62, %v1049_v6  ;;  %v1052_v34 = vmul.f32 %v1313_v31, %v2484_v33 }
 0x18e   : > { %v1018_v23 = vpop.f32.mrf.mxu1 }
 0x18f   : > { %1106 = vst [vmem:[%s2498_s28 + $0x70] sm:$0xff] %v1090_v15  ;;  %v1088_v21 = vmax.f32 %v1072_v19, 0.0  ;;  %v1075_v0 = vadd.f32 %v2489_v62, %v1052_v34  ;;  %v1050_v7 = vmul.f32 %v2484_v33, %v1018_v23 }
 0x191   : > { %v1304_v14 = vpop.f32.mrf.mxu0  ;;  %1104 = vst [vmem:[%s2498_s28 + $0x60] sm:$0xff] %v1088_v21  ;;  %v1091_v22 = vmax.f32 %v1075_v0, 0.0  ;;  %v1073_v4 = vadd.f32 %v2489_v62, %v1050_v7 }
 0x192   : > { %v1043_v32 = vmul.f32 %v1304_v14, %v2484_v33 }
 0x193   : > { %v983_v53 = vpop.f32.mrf.mxu0  ;;  %1107 = vst [vmem:[%s2498_s28 + $0x78] sm:$0xff] %v1091_v22  ;;  %v1089_v11 = vmax.f32 %v1073_v4, 0.0 }
 0x194   : > { %v1066_v36 = vadd.f32 %v2489_v62, %v1043_v32  ;;  %v1041_v45 = vmul.f32 %v2484_v33, %v983_v53 }
 0x195   : > { %v1305_v55 = vpop.f32.mrf.mxu0  ;;  %1105 = vst [vmem:[%s2498_s28 + $0x68] sm:$0xff] %v1089_v11 }
 0x196   : > { %v1082_v9 = vmax.f32 %v1066_v36, 0.0  ;;  %v1064_v41 = vadd.f32 %v2489_v62, %v1041_v45  ;;  %v1044_v2 = vmul.f32 %v1305_v55, %v2484_v33 }
 0x197   : > { %v986_v26 = vpop.f32.mrf.mxu0 }
 0x198   : > { %1098 = vst [vmem:[%s2498_s28 + $0x30] sm:$0xff] %v1082_v9  ;;  %v1080_v58 = vmax.f32 %v1064_v41, 0.0  ;;  %v1067_v29 = vadd.f32 %v2489_v62, %v1044_v2  ;;  %v1042_v42 = vmul.f32 %v2484_v33, %v986_v26 }
 0x19a   : > { %1096 = vst [vmem:[%s2498_s28 + $0x20] sm:$0xff] %v1080_v58  ;;  %v1083_v27 = vmax.f32 %v1067_v29, 0.0  ;;  %v1065_v54 = vadd.f32 %v2489_v62, %v1042_v42 }
 0x19c   : > { %1099 = vst [vmem:[%s2498_s28 + $0x38] sm:$0xff] %v1083_v27  ;;  %v1081_v38 = vmax.f32 %v1065_v54, 0.0 }
 0x19e   : > { %1097 = vst [vmem:[%s2498_s28 + $0x28] sm:$0xff] %v1081_v38 }
 0x19f   : > { %1560 = shalt.err (!%p1557_p13)
}
 0x1a0   : > { %s1561_s14 = scalar_lea.hbm %s2547_s13, 2048  ;;  %s1565_s10 = scalar_lea.hbm %s2701_s18, 8192 }
 0x1a1   : > { %p1562_p0 = scmp.ne.s32.totalorder %s2547_s13, %s1561_s14  ;;  %p1566_p3 = scmp.lt.s32.totalorder %s2547_s13, %s2701_s18 }
 0x1a2   : > { %p1567_p10 = scmp.lt.s32.totalorder %s1565_s10, %s1561_s14 }
 0x1a3   : > { %p1563_p8 = pnand %p1562_p0, %p2702_p4 }
 0x1a4   : > { %p1568_p12 = por %p1567_p10, %p1566_p3 }
 0x1a5   : > { %p1564_p11 = pneg %p1563_p8 }
 0x1a7   : > { %p1569_p2 = pnand %p1568_p12, %p1564_p11 }
 0x1a9   : > { %1572 = shalt.err (!%p1569_p2)
}
 0x1aa   : > { %s1681_s24 = smov 128   ;;  %s1682_s16 = smov 8  }
 0x1ab   : > { %1332 = dma.vmem_to_hbm [thread:$0]  (%p2702_p4), %s2549_s1, 2048, %s2547_s13, %s2555_s20, %s1681_s24, %s1681_s24, %s1682_s16  }
 0x1ac PF: > { %s2703_s3 = sld [smem:[#allocation12_spill]]  ;;  %p1354_p6 = scmp.ge.s32.totalorder %s1671_s7, 2 }
 0x1ad   : > { %s2704_s11 = sld [smem:[#allocation16_spill]] }
 0x1b2   : > { %s1139_s8 = sand.u32 1, %s2703_s3  }
 0x1b3   : > { %p2705_p5 = scmp.ne.s32.totalorder %s2704_s11, 0  ;;  %s1140_s9 = scalar_lea.sflag [#allocation4], %s1139_s8 }
 0x1b5   : > { %p1346_p1 = pnand %p1354_p6, %p2705_p5 }
 0x1b7   : > { %p1347_p7 = pneg %p1346_p1 }
 0x1b9   : > { %1626 = dma.done.wait (%p1347_p7), %s1140_s9, 2048  }
 0x1ba   : > { %1628 = vsyncadd (%p1347_p7), %s1140_s9, 4294965248  ;;  %s23_s7 = sadd.s32 1, %s1671_s7   ;;  %s2706_s27 = sld [smem:[#allocation14_spill]] }
 0x1bb   : > { %p20_p9 = scmp.ge.s32.totalorder %s23_s7, 6   ;;  %s2707_s1 = sld [smem:[#allocation17_spill]] }
 0x1bc   : > { %s2708_s21 = smov %s1635_s22  ;;  %s2709_s22 = smov %s1639_s23 }
 0x1bd   : > { %s2710_s23 = smov %s1860_s29  ;;  %s2711_s24 = smov %s1647_s25 }
 0x1be   : > { %s2712_s25 = smov %s1651_s26  ;;  %s2713_s26 = smov %s1855_s6 }
 0x1bf   : > { %s2714_s28 = smov %s1667_s30  ;;  %s2716_s30 = smov %s2722_s17 }
 0x1c0   :  { %22 = sbr.rel (!%p20_p9) target bundleno = 15 (0xf), region = 100 }
 0x1c1   : > { %s2715_s29 = smov %s2707_s1 }
 0x1c5   :  { %1145 = vsyncpa [#allocation3], 1 }
 0x1c6   :  { %1147 = vsyncpa [#allocation3 + $0x1], 1 }
 0x1c7   :  { %1148 = vsyncpa [#allocation6], 1 }
 0x1c8   :  { %1149 = vsyncpa [#allocation4], 1 }
 0x1c9   :  { %1151 = vsyncpa [#allocation4 + $0x1], 1 }

</bundles_post_ra>
